<compile_context>
chip_gen: v7x
topology: tpu7x:2x2x1
jax: 0.10.0
libtpu: 0.0.40
codegen_flags: <defaults>
</compile_context>

<pallas_src>
import functools

import jax
import jax.numpy as jnp
from jax import lax
from jax.experimental import pallas as pl
from jax.experimental.pallas import tpu as pltpu


def _round_up(x, m):
    return (x + m - 1) // m * m


# --------------------------------------------------------------------------- #
# Kernel — batch on the lane axis throughout
# --------------------------------------------------------------------------- #
def lstmfcn_kernel(x_ref, wx_ref, w2_ref, w3_ref, wch_ref, wcf_ref, b_ref,
                   out_ref, *, hidden, d1, d2, d3):
    H = hidden
    G = 3 * H                                    # i|o|g gate width
    b = b_ref[...]                               # (G+d1+d2+d3+num_out, 1) f32

    # One fused matmul for everything that consumes x:
    #   rows [0, G)      -> LSTM gate pre-activations (packed i|o|g)
    #   rows [G, G+d1)   -> conv layer 1 pre-activation (block-Toeplitz form)
    zx = jnp.dot(wx_ref[...], x_ref[...],
                 preferred_element_type=jnp.float32)       # (G+d1, tile_b) f32
    zx = zx + b[:G + d1]

    # ---- BlockLSTM: single cell step, h0 = c0 = 0 (forget gate dropped) ----
    io = jax.nn.sigmoid(zx[0:2 * H])                       # i|o in one slab
    g = jnp.tanh(zx[2 * H:G])
    h = io[H:2 * H] * jnp.tanh(io[0:H] * g)                # (H, tile_b) f32

    # ---- BlockFCN: each Conv1d+BN(eval)+ReLU is one dense matmul -----------
    o1, o2, o3 = G + d1, G + d1 + d2, G + d1 + d2 + d3
    a1 = jnp.maximum(zx[G:], 0.0).astype(jnp.bfloat16)               # (d1, tile_b)
    a2 = jnp.dot(w2_ref[...], a1, preferred_element_type=jnp.float32)
    a2 = jnp.maximum(a2 + b[o1:o2], 0.0).astype(jnp.bfloat16)        # (d2, tile_b)
    a3 = jnp.dot(w3_ref[...], a2, preferred_element_type=jnp.float32)
    a3 = jnp.maximum(a3 + b[o2:o3], 0.0).astype(jnp.bfloat16)        # (d3, tile_b)

    # ---- classifier on cat([h, avgpool(a3)]) -------------------------------
    # The 1/L3 global-average-pool factor is folded into the wcf rows.
    out = (jnp.dot(wch_ref[...], h.astype(jnp.bfloat16),
                   preferred_element_type=jnp.float32)
           + jnp.dot(wcf_ref[...], a3, preferred_element_type=jnp.float32)
           + b[o3:])                                       # (num_out, tile_b)
    out_ref[...] = out.astype(out_ref.dtype)


# --------------------------------------------------------------------------- #
# Wrapper
# --------------------------------------------------------------------------- #
def lstmfcn_forward(x, kp):
    """x: (B, T); kp: dict produced by prepare_params."""
    B, T = x.shape
    H, d1, d2, d3 = kp["hidden"], kp["d1"], kp["d2"], kp["d3"]
    num_out = kp["num_out"]
    G = 3 * H

    # Batch is the lane axis -> tile it in multiples of 128.  Keep >=2 grid
    # steps at scale (v7x megacore) and cap per-tile working set (~<16 MiB of
    # f32 intermediates at tile_b=2048, comfortably inside the VMEM limit).
    if B <= 256:
        tile_b = _round_up(max(B, 1), 128)
    else:
        tile_b = min(2048, _round_up(pl.cdiv(B, 2), 128))
    B_pad = _round_up(B, tile_b)          # explicit remainder padding
    grid = (B_pad // tile_b,)

    # (B, T) -> lane-major (T, B_pad) bf16.  Tiny XLA-side transpose/pad; the
    # savings from the lane-dense (num_out, B) output dwarf this extra pass.
    x_t = jnp.pad(x.astype(jnp.bfloat16).T, ((0, 0), (0, B_pad - B)))

    flops = 2 * B_pad * (T * (G + d1) + d1 * d2 + d2 * d3 + (H + d3) * num_out)
    bytes_accessed = (2 * (x_t.size + kp["wx"].size + kp["w2"].size
                           + kp["w3"].size + kp["wch"].size + kp["wcf"].size)
                      + 4 * kp["biases"].size + 4 * num_out * B_pad)

    def const_spec(arr):
        # Constant block index => Pallas never re-DMAs these across grid steps.
        # (pl.Buffered(1) would also drop the spare VMEM buffer, but the
        #  weights total <1 MiB so it is not worth the lowering risk.)
        return pl.BlockSpec(arr.shape, lambda i: (0, 0))

    kern = functools.partial(lstmfcn_kernel, hidden=H, d1=d1, d2=d2, d3=d3)
    out_t = pl.pallas_call(
        kern,
        out_shape=jax.ShapeDtypeStruct((num_out, B_pad), jnp.float32),
        grid=grid,
        in_specs=[
            pl.BlockSpec((T, tile_b), lambda i: (0, i)),
            const_spec(kp["wx"]),
            const_spec(kp["w2"]),
            const_spec(kp["w3"]),
            const_spec(kp["wch"]),
            const_spec(kp["wcf"]),
            const_spec(kp["biases"]),
        ],
        out_specs=pl.BlockSpec((num_out, tile_b), lambda i: (0, i)),
        compiler_params=pltpu.CompilerParams(
            dimension_semantics=("parallel",),
            vmem_limit_bytes=48 * 1024 * 1024),   # > v5e 16MiB default, < v7x 64MiB/TC
        cost_estimate=pl.CostEstimate(flops=flops,
                                      transcendentals=4 * B_pad * H,
                                      bytes_accessed=bytes_accessed),
    )(x_t, kp["wx"], kp["w2"], kp["w3"], kp["wch"], kp["wcf"], kp["biases"])
    return out_t[:, :B].T                         # (B, num_out)


# --------------------------------------------------------------------------- #
# Parameter preprocessing (torch-layout params -> packed kernel inputs)
# --------------------------------------------------------------------------- #
def prepare_params(p, eps=1e-3):
    # NOTE: eps=1e-3 follows the Keras-style BlockFCN; PyTorch BatchNorm1d
    # default is 1e-5 — pass eps accordingly when matching a real checkpoint.
    H4, T = p["lstm_w_ih"].shape
    H = H4 // 4

    # LSTM: keep only i/g/o gates (f is dead since c0 == 0); fold b_ih + b_hh;
    # pack gates [i|o|g] so both sigmoid gates share one 128-sublane slab.
    w_ih = p["lstm_w_ih"].astype(jnp.float32)            # (4H, T): gates i,f,g,o
    bsum = (p["lstm_b_ih"] + p["lstm_b_hh"]).astype(jnp.float32)
    w_iog = jnp.concatenate([w_ih[0:H], w_ih[3 * H:4 * H], w_ih[2 * H:3 * H]], 0)
    b_iog = jnp.concatenate([bsum[0:H], bsum[3 * H:4 * H], bsum[2 * H:3 * H]])

    # Conv layers: fold BN(eval) into (w, b), expand to block-Toeplitz matrices
    # acting on the flattened (length * channels) feature axis; stored
    # transposed so the batch can sit on the lane axis inside the kernel.
    l_in = T
    toes_t, bias_blks, dims = [], [], []
    for li in (1, 2, 3):
        w = p[f"conv{li}_w"].astype(jnp.float32)         # (C_out, C_in, K)
        c_out, c_in, K = w.shape
        scale = p[f"bn{li}_g"] / jnp.sqrt(p[f"bn{li}_v"] + eps)
        wf = jnp.transpose(w, (2, 1, 0)) * scale[None, None, :]      # (K, C_in, C_out)
        bf = (p[f"conv{li}_b"] - p[f"bn{li}_m"]) * scale + p[f"bn{li}_be"]
        l_out = l_in - K + 1
        blk = jnp.zeros((l_in, c_in, l_out, c_out), jnp.float32)
        for l in range(l_out):
            blk = blk.at[l:l + K, :, l, :].set(wf)
        toes_t.append(blk.reshape(l_in * c_in, l_out * c_out).T)     # (d_out, d_in)
        bias_blks.append(jnp.tile(bf, l_out))
        dims.append(l_out * c_out)
        l_in = l_out
    l3 = l_in

    # Classifier (num_out, H + C3): first H columns act on h, the rest on the
    # pooled fcn features; fold the 1/L3 pooling and tile over L3 positions.
    wcls = p["cls_w"].astype(jnp.float32)
    num_out = wcls.shape[0]
    wch = wcls[:, :H]                                    # (num_out, H)
    wcf = jnp.tile(wcls[:, H:] / l3, (1, l3))            # (num_out, L3*C3)

    # Fused x-side weight and one packed bias column (all sublane offsets are
    # multiples of 8: 0, 3H, 3H+d1, +d2, +d3).
    wx = jnp.concatenate([w_iog, toes_t[0]], axis=0)     # (3H + d1, T)
    biases = jnp.concatenate([b_iog, bias_blks[0], bias_blks[1], bias_blks[2],
                              p["cls_b"].astype(jnp.float32)])[:, None]

    bf16 = jnp.bfloat16
    return dict(wx=wx.astype(bf16), w2=toes_t[1].astype(bf16),
                w3=toes_t[2].astype(bf16), wch=wch.astype(bf16),
                wcf=wcf.astype(bf16), biases=biases,
                hidden=H, d1=dims[0], d2=dims[1], d3=dims[2],
                num_out=num_out)


# --------------------------------------------------------------------------- #
# Torch-layout parameter init + independent pure-JAX reference
# --------------------------------------------------------------------------- #
def init_params(key, time_steps, num_variables=1, lstm_hs=64,
                channels=(1, 32, 64, 32), kernels=(8, 5, 3)):
    ks = iter(jax.random.split(key, 32))

    def u(shape, fan_in):
        s = 1.0 / float(fan_in) ** 0.5
        return jax.random.uniform(next(ks), shape, jnp.float32, -s, s)

    H = lstm_hs
    T = time_steps * channels[0]
    p = {}
    # nn.LSTM params ~ U(-1/sqrt(H), 1/sqrt(H)); weight_hh is omitted because
    # with a length-1 sequence and h0 == 0 it never contributes to the output.
    p["lstm_w_ih"] = u((4 * H, T), H)
    p["lstm_b_ih"] = u((4 * H,), H)
    p["lstm_b_hh"] = u((4 * H,), H)
    for li, (cin, cout, K) in enumerate(zip(channels[:-1], channels[1:], kernels), 1):
        p[f"conv{li}_w"] = u((cout, cin, K), cin * K)
        p[f"conv{li}_b"] = u((cout,), cin * K)
        # non-trivial running stats so the BN folding path is actually exercised
        p[f"bn{li}_g"] = 1.0 + 0.1 * jax.random.normal(next(ks), (cout,), jnp.float32)
        p[f"bn{li}_be"] = 0.1 * jax.random.normal(next(ks), (cout,), jnp.float32)
        p[f"bn{li}_m"] = 0.1 * jax.random.normal(next(ks), (cout,), jnp.float32)
        p[f"bn{li}_v"] = 1.0 + 0.5 * jax.random.uniform(next(ks), (cout,), jnp.float32)
    embed = channels[-1] + H
    p["cls_w"] = u((num_variables, embed), embed)
    p["cls_b"] = u((num_variables,), embed)
    return p


def reference_forward(x, p, eps=1e-3):
    """Pure-JAX f32 reference following the PyTorch module literally."""
    H = p["lstm_b_ih"].shape[0] // 4
    # BlockLSTM: one step, h0 = c0 = 0 (torch gate order i, f, g, o)
    z = x @ p["lstm_w_ih"].T + p["lstm_b_ih"] + p["lstm_b_hh"]
    i = jax.nn.sigmoid(z[:, 0:H])
    g = jnp.tanh(z[:, 2 * H:3 * H])
    o = jax.nn.sigmoid(z[:, 3 * H:4 * H])
    h = o * jnp.tanh(i * g)                       # c = i*g + f*c0, c0 == 0
    # BlockFCN (NCL layout like torch)
    y = x[:, None, :]
    for li in (1, 2, 3):
        y = lax.conv_general_dilated(
            y, p[f"conv{li}_w"], (1,), "VALID",
            dimension_numbers=("NCH", "OIH", "NCH"),
            precision=lax.Precision.HIGHEST)
        y = y + p[f"conv{li}_b"][None, :, None]
        inv = p[f"bn{li}_g"] / jnp.sqrt(p[f"bn{li}_v"] + eps)
        y = (y - p[f"bn{li}_m"][None, :, None]) * inv[None, :, None] \
            + p[f"bn{li}_be"][None, :, None]
        y = jnp.maximum(y, 0.0)
    pooled = jnp.mean(y, axis=2)                  # global average pool
    feat = jnp.concatenate([h, pooled], axis=1)
    return feat @ p["cls_w"].T + p["cls_b"]


if __name__ == "__main__":
    key = jax.random.PRNGKey(0)
    kx, kp_key = jax.random.split(key)

    B, T = 2, 16                                  # small shapes: batch=2, time_steps=16
    x = jax.random.normal(kx, (B, T), jnp.float32)
    params = init_params(kp_key, time_steps=T, num_variables=1, lstm_hs=64,
                         channels=(1, 32, 64, 32), kernels=(8, 5, 3))
    kparams = prepare_params(params)

    out = lstmfcn_forward(x, kparams)
    out = jax.block_until_ready(out)
    assert out.shape == (B, 1), out.shape

    ref = reference_forward(x, params)
    # bf16 MXU inputs vs a HIGHEST-precision f32 reference -> relaxed tolerance.
    assert jnp.allclose(out, ref, atol=5e-2, rtol=5e-2), (out, ref)

    print("KERNEL_OK")
</pallas_src>

<mosaic_0001>
module attributes {stable_mosaic.version = 11 : i64} {
  func.func @lstmfcn_kernel(%arg0: i32, %arg1: memref<16x128xbf16, #tpu.memory_space<vmem>>, %arg2: memref<480x16xbf16, #tpu.memory_space<vmem>>, %arg3: memref<320x288xbf16, #tpu.memory_space<vmem>>, %arg4: memref<96x320xbf16, #tpu.memory_space<vmem>>, %arg5: memref<1x64xbf16, #tpu.memory_space<vmem>>, %arg6: memref<1x96xbf16, #tpu.memory_space<vmem>>, %arg7: memref<897x1xf32, #tpu.memory_space<vmem>>, %arg8: memref<1x128xf32, #tpu.memory_space<vmem>>) attributes {dimension_semantics = [#tpu.dimension_semantics<parallel>], iteration_bounds = array<i64: 1>, scalar_prefetch = 0 : i64, scratch_operands = 0 : i64, tpu.core_type = #tpu.core_type<tc>, window_params = [{transform_indices = @transform_0, window_bounds = array<i64: 16, 128>}, {pipeline_mode = #tpu.pipeline_mode<synchronous>, transform_indices = @transform_1, window_bounds = array<i64: 480, 16>}, {pipeline_mode = #tpu.pipeline_mode<synchronous>, transform_indices = @transform_2, window_bounds = array<i64: 320, 288>}, {pipeline_mode = #tpu.pipeline_mode<synchronous>, transform_indices = @transform_3, window_bounds = array<i64: 96, 320>}, {pipeline_mode = #tpu.pipeline_mode<synchronous>, transform_indices = @transform_4, window_bounds = array<i64: 1, 64>}, {pipeline_mode = #tpu.pipeline_mode<synchronous>, transform_indices = @transform_5, window_bounds = array<i64: 1, 96>}, {pipeline_mode = #tpu.pipeline_mode<synchronous>, transform_indices = @transform_6, window_bounds = array<i64: 897, 1>}, {transform_indices = @transform_7, window_bounds = array<i64: 1, 128>}]} {
    %c0 = arith.constant 0 : index
    %c0_0 = arith.constant 0 : index
    %0 = vector.load %arg7[%c0, %c0_0] : memref<897x1xf32, #tpu.memory_space<vmem>>, vector<897x1xf32>
    %c0_1 = arith.constant 0 : index
    %c0_2 = arith.constant 0 : index
    %1 = vector.load %arg2[%c0_1, %c0_2] : memref<480x16xbf16, #tpu.memory_space<vmem>>, vector<480x16xbf16>
    %c0_3 = arith.constant 0 : index
    %c0_4 = arith.constant 0 : index
    %2 = vector.load %arg1[%c0_3, %c0_4] : memref<16x128xbf16, #tpu.memory_space<vmem>>, vector<16x128xbf16>
    %cst = arith.constant dense<0.000000e+00> : vector<480x128xf32>
    %3 = tpu.matmul %1, %2, %cst {dimension_numbers = #tpu.dot_dimension_numbers<[1], [0], [0], [1], [0, 0, 1, 1], [], []>} : vector<480x16xbf16>, vector<16x128xbf16>, vector<480x128xf32> -> vector<480x128xf32>
    %4 = vector.extract_strided_slice %0 {offsets = [0, 0], sizes = [480, 1], strides = [1, 1]} : vector<897x1xf32> to vector<480x1xf32>
    %5 = vector.broadcast %4 : vector<480x1xf32> to vector<480x128xf32>
    %6 = arith.addf %3, %5 : vector<480x128xf32>
    %7 = vector.extract_strided_slice %6 {offsets = [0, 0], sizes = [128, 128], strides = [1, 1]} : vector<480x128xf32> to vector<128x128xf32>
    %8 = arith.negf %7 : vector<128x128xf32>
    %9 = math.exp %8 : vector<128x128xf32>
    %cst_5 = arith.constant 1.000000e+00 : f32
    %10 = vector.broadcast %cst_5 : f32 to vector<128x128xf32>
    %11 = arith.addf %10, %9 : vector<128x128xf32>
    %12 = arith.divf %10, %11 : vector<128x128xf32>
    %13 = vector.extract_strided_slice %6 {offsets = [128, 0], sizes = [64, 128], strides = [1, 1]} : vector<480x128xf32> to vector<64x128xf32>
    %14 = math.tanh %13 : vector<64x128xf32>
    %15 = vector.extract_strided_slice %12 {offsets = [64, 0], sizes = [64, 128], strides = [1, 1]} : vector<128x128xf32> to vector<64x128xf32>
    %16 = vector.extract_strided_slice %12 {offsets = [0, 0], sizes = [64, 128], strides = [1, 1]} : vector<128x128xf32> to vector<64x128xf32>
    %17 = arith.mulf %16, %14 : vector<64x128xf32>
    %18 = math.tanh %17 : vector<64x128xf32>
    %19 = arith.mulf %15, %18 : vector<64x128xf32>
    %20 = vector.extract_strided_slice %6 {offsets = [192, 0], sizes = [288, 128], strides = [1, 1]} : vector<480x128xf32> to vector<288x128xf32>
    %cst_6 = arith.constant 0.000000e+00 : f32
    %21 = vector.broadcast %cst_6 : f32 to vector<288x128xf32>
    %22 = arith.maximumf %20, %21 : vector<288x128xf32>
    %23 = arith.truncf %22 : vector<288x128xf32> to vector<288x128xbf16>
    %c0_7 = arith.constant 0 : index
    %c0_8 = arith.constant 0 : index
    %24 = vector.load %arg3[%c0_7, %c0_8] : memref<320x288xbf16, #tpu.memory_space<vmem>>, vector<320x288xbf16>
    %cst_9 = arith.constant dense<0.000000e+00> : vector<320x128xf32>
    %25 = tpu.matmul %24, %23, %cst_9 {dimension_numbers = #tpu.dot_dimension_numbers<[1], [0], [0], [1], [0, 0, 1, 1], [], []>} : vector<320x288xbf16>, vector<288x128xbf16>, vector<320x128xf32> -> vector<320x128xf32>
    %26 = vector.extract_strided_slice %0 {offsets = [480, 0], sizes = [320, 1], strides = [1, 1]} : vector<897x1xf32> to vector<320x1xf32>
    %27 = vector.broadcast %26 : vector<320x1xf32> to vector<320x128xf32>
    %28 = arith.addf %25, %27 : vector<320x128xf32>
    %cst_10 = arith.constant 0.000000e+00 : f32
    %29 = vector.broadcast %cst_10 : f32 to vector<320x128xf32>
    %30 = arith.maximumf %28, %29 : vector<320x128xf32>
    %31 = arith.truncf %30 : vector<320x128xf32> to vector<320x128xbf16>
    %c0_11 = arith.constant 0 : index
    %c0_12 = arith.constant 0 : index
    %32 = vector.load %arg4[%c0_11, %c0_12] : memref<96x320xbf16, #tpu.memory_space<vmem>>, vector<96x320xbf16>
    %cst_13 = arith.constant dense<0.000000e+00> : vector<96x128xf32>
    %33 = tpu.matmul %32, %31, %cst_13 {dimension_numbers = #tpu.dot_dimension_numbers<[1], [0], [0], [1], [0, 0, 1, 1], [], []>} : vector<96x320xbf16>, vector<320x128xbf16>, vector<96x128xf32> -> vector<96x128xf32>
    %34 = vector.extract_strided_slice %0 {offsets = [800, 0], sizes = [96, 1], strides = [1, 1]} : vector<897x1xf32> to vector<96x1xf32>
    %35 = vector.broadcast %34 : vector<96x1xf32> to vector<96x128xf32>
    %36 = arith.addf %33, %35 : vector<96x128xf32>
    %cst_14 = arith.constant 0.000000e+00 : f32
    %37 = vector.broadcast %cst_14 : f32 to vector<96x128xf32>
    %38 = arith.maximumf %36, %37 : vector<96x128xf32>
    %39 = arith.truncf %38 : vector<96x128xf32> to vector<96x128xbf16>
    %c0_15 = arith.constant 0 : index
    %c0_16 = arith.constant 0 : index
    %40 = vector.load %arg5[%c0_15, %c0_16] : memref<1x64xbf16, #tpu.memory_space<vmem>>, vector<1x64xbf16>
    %41 = arith.truncf %19 : vector<64x128xf32> to vector<64x128xbf16>
    %cst_17 = arith.constant dense<0.000000e+00> : vector<1x128xf32>
    %42 = tpu.matmul %40, %41, %cst_17 {dimension_numbers = #tpu.dot_dimension_numbers<[1], [0], [0], [1], [0, 0, 1, 1], [], []>} : vector<1x64xbf16>, vector<64x128xbf16>, vector<1x128xf32> -> vector<1x128xf32>
    %c0_18 = arith.constant 0 : index
    %c0_19 = arith.constant 0 : index
    %43 = vector.load %arg6[%c0_18, %c0_19] : memref<1x96xbf16, #tpu.memory_space<vmem>>, vector<1x96xbf16>
    %cst_20 = arith.constant dense<0.000000e+00> : vector<1x128xf32>
    %44 = tpu.matmul %43, %39, %cst_20 {dimension_numbers = #tpu.dot_dimension_numbers<[1], [0], [0], [1], [0, 0, 1, 1], [], []>} : vector<1x96xbf16>, vector<96x128xbf16>, vector<1x128xf32> -> vector<1x128xf32>
    %45 = arith.addf %42, %44 : vector<1x128xf32>
    %46 = vector.extract_strided_slice %0 {offsets = [896, 0], sizes = [1, 1], strides = [1, 1]} : vector<897x1xf32> to vector<1x1xf32>
    %47 = vector.broadcast %46 : vector<1x1xf32> to vector<1x128xf32>
    %48 = arith.addf %45, %47 : vector<1x128xf32>
    %c0_21 = arith.constant 0 : index
    %c0_22 = arith.constant 0 : index
    %49 = vector.load %arg8[%c0_21, %c0_22] : memref<1x128xf32, #tpu.memory_space<vmem>>, vector<1x128xf32>
    tpu.vector_store %arg8[%c0_21, %c0_22], %48 {strides = array<i32>} : memref<1x128xf32, #tpu.memory_space<vmem>>, vector<1x128xf32>,
    return
  }
  func.func @transform_0(%arg0: i32) -> (i32, i32) {
    %c0_i32 = arith.constant 0 : i32
    %c0_i32_0 = arith.constant 0 : i32
    return %c0_i32, %arg0 : i32, i32
  }
  func.func @transform_1(%arg0: i32) -> (i32, i32) {
    %c0_i32 = arith.constant 0 : i32
    %c0_i32_0 = arith.constant 0 : i32
    %c0_i32_1 = arith.constant 0 : i32
    return %c0_i32, %c0_i32_0 : i32, i32
  }
  func.func @transform_2(%arg0: i32) -> (i32, i32) {
    %c0_i32 = arith.constant 0 : i32
    %c0_i32_0 = arith.constant 0 : i32
    %c0_i32_1 = arith.constant 0 : i32
    return %c0_i32, %c0_i32_0 : i32, i32
  }
  func.func @transform_3(%arg0: i32) -> (i32, i32) {
    %c0_i32 = arith.constant 0 : i32
    %c0_i32_0 = arith.constant 0 : i32
    %c0_i32_1 = arith.constant 0 : i32
    return %c0_i32, %c0_i32_0 : i32, i32
  }
  func.func @transform_4(%arg0: i32) -> (i32, i32) {
    %c0_i32 = arith.constant 0 : i32
    %c0_i32_0 = arith.constant 0 : i32
    %c0_i32_1 = arith.constant 0 : i32
    return %c0_i32, %c0_i32_0 : i32, i32
  }
  func.func @transform_5(%arg0: i32) -> (i32, i32) {
    %c0_i32 = arith.constant 0 : i32
    %c0_i32_0 = arith.constant 0 : i32
    %c0_i32_1 = arith.constant 0 : i32
    return %c0_i32, %c0_i32_0 : i32, i32
  }
  func.func @transform_6(%arg0: i32) -> (i32, i32) {
    %c0_i32 = arith.constant 0 : i32
    %c0_i32_0 = arith.constant 0 : i32
    %c0_i32_1 = arith.constant 0 : i32
    return %c0_i32, %c0_i32_0 : i32, i32
  }
  func.func @transform_7(%arg0: i32) -> (i32, i32) {
    %c0_i32 = arith.constant 0 : i32
    %c0_i32_0 = arith.constant 0 : i32
    return %c0_i32, %arg0 : i32, i32
  }
}

</mosaic_0001>

<bundles_post_ra>
// kernel: tpu_custom_call.1
= control target key start
LH: loop header
LB: loop body
LE: loop exit
PB: predicated region body
PF: predicated region fallthrough
CT: control target
= control target key end

     0   :  { %v4771_v2 = vmov 0   ;;  %vm659_vm0 = vcmask 130048   ;;  %s4763_s0 = inlined_call_operand.vmem [shape: bf16[16,128], index: 0, kind: input, shape index: {}]   ;;  %s4764_s1 = inlined_call_operand.vmem [shape: bf16[480,16], index: 1, kind: input, shape index: {}]   ;;  %s4765_s2 = inlined_call_operand.vmem [shape: bf16[320,288], index: 2, kind: input, shape index: {}]   ;;  %s4766_s3 = inlined_call_operand.vmem [shape: bf16[96,320], index: 3, kind: input, shape index: {}]   ;;  %s4767_s4 = inlined_call_operand.vmem [shape: bf16[1,64], index: 4, kind: input, shape index: {}]   ;;  %s4768_s5 = inlined_call_operand.vmem [shape: bf16[1,96], index: 5, kind: input, shape index: {}]   ;;  %s4769_s6 = inlined_call_operand.vmem [shape: f32[897,1], index: 6, kind: input, shape index: {}]   ;;  %s4770_s7 = inlined_call_operand.hbm [shape: f32[1,128], index: 7, kind: output, shape index: {}]  }
   0x1   :  { %v54_v0 = vld [vmem:[%s4769_s6 + $0xd0] sm:$0xff]  ;;  %v52_v1 = vld [vmem:[%s4769_s6 + $0xc0] sm:$0xff]  ;;  %3248 = vset.pattern.permute.xlu1 %v4771_v2  ;;  %3247 = vset.pattern.permute.xlu0 %v4771_v2  ;;  %v55_v5 = vld [vmem:[%s4769_s6 + $0xd8] sm:$0xff] }
   0x2   :  { %v3249_v3 = vld [vmem:[%s4763_s0] sm:$0xff]   ;;  %335 = vperm.xlu1 %3248, %v54_v0   ;;  %325 = vperm.xlu0 %3247, %v52_v1   ;;  %v53_v6 = vld [vmem:[%s4769_s6 + $0xc8] sm:$0xff]  ;;  %v3252_v8 = vld [vmem:[%s4764_s1 + $0x10] sm:$0xff]  }
   0x3   :  { %v3250_v4 = vld [vmem:[%s4764_s1] sm:$0xff]   ;;  %3089 = vmatprep.subr.bf16.mxu0 %v3249_v3  ;;  %1846 = vmatprep.subr.bf16.mxu1 %v4771_v2  ;;  %v3251_v7 = vld [vmem:[%s4764_s1 + $0x8] sm:$0xff]   ;;  %v59_v11 = vld [vmem:[%s4769_s6 + $0xf8] sm:$0xff] }
   0x4   :  { %3090 = vmatpush3.bf16.msra.mxu0 %v3249_v3  ;;  %3091 = vmatprep.mubr.msk.bf16.mxu0 %vm659_vm0, %v3250_v4  ;;  %v57_v9 = vld [vmem:[%s4769_s6 + $0xe8] sm:$0xff]  ;;  %v56_v10 = vld [vmem:[%s4769_s6 + $0xe0] sm:$0xff]  ;;  %v58_v12 = vld [vmem:[%s4769_s6 + $0xf0] sm:$0xff] }
   0x5   :  { %v3253_v13 = vld [vmem:[%s4764_s1 + $0x18] sm:$0xff]   ;;  %v3254_v14 = vld [vmem:[%s4764_s1 + $0x20] sm:$0xff]   ;;  %v61_v15 = vld [vmem:[%s4769_s6 + $0x108] sm:$0xff] }
   0x6   :  { %340 = vperm.xlu1 %3248, %v55_v5   ;;  %330 = vperm.xlu0 %3247, %v53_v6   ;;  %v60_v16 = vld [vmem:[%s4769_s6 + $0x100] sm:$0xff]  ;;  %v63_v17 = vld [vmem:[%s4769_s6 + $0x118] sm:$0xff]  ;;  %v62_v18 = vld [vmem:[%s4769_s6 + $0x110] sm:$0xff] }
   0x7   :  { %3092 = vmatmul.mubr.msk.bf16.vlgmr.msra.gmra.mrb[0].mxu0 %vm659_vm0, %v3251_v7  ;;  %v3255_v19 = vld [vmem:[%s4764_s1 + $0x28] sm:$0xff]   ;;  %v3256_v20 = vld [vmem:[%s4764_s1 + $0x30] sm:$0xff]   ;;  %v64_v22 = vld [vmem:[%s4769_s6 + $0x120] sm:$0xff] }
   0x8   :  { %3095 = vmatprep.mubr.msk.bf16.mxu0 %vm659_vm0, %v3252_v8  ;;  %v65_v21 = vld [vmem:[%s4769_s6 + $0x128] sm:$0xff]  ;;  %v67_v23 = vld [vmem:[%s4769_s6 + $0x138] sm:$0xff]  ;;  %v66_v24 = vld [vmem:[%s4769_s6 + $0x130] sm:$0xff] }
   0x9   :  { %v3257_v25 = vld [vmem:[%s4764_s1 + $0x38] sm:$0xff]   ;;  %v3258_v26 = vld [vmem:[%s4764_s1 + $0x40] sm:$0xff]   ;;  %v69_v27 = vld [vmem:[%s4769_s6 + $0x148] sm:$0xff] }
   0xa   :  { %350 = vperm.xlu1 %3248, %v57_v9   ;;  %345 = vperm.xlu0 %3247, %v56_v10   ;;  %v68_v28 = vld [vmem:[%s4769_s6 + $0x140] sm:$0xff]  ;;  %v71_v29 = vld [vmem:[%s4769_s6 + $0x158] sm:$0xff]  ;;  %v70_v30 = vld [vmem:[%s4769_s6 + $0x150] sm:$0xff] }
   0xb   :  { %v3259_v31 = vld [vmem:[%s4764_s1 + $0x48] sm:$0xff]   ;;  %v3260_v32 = vld [vmem:[%s4764_s1 + $0x50] sm:$0xff]   ;;  %v72_v34 = vld [vmem:[%s4769_s6 + $0x160] sm:$0xff] }
   0xc   :  { %v73_v33 = vld [vmem:[%s4769_s6 + $0x168] sm:$0xff]  ;;  %v75_v35 = vld [vmem:[%s4769_s6 + $0x178] sm:$0xff]  ;;  %v74_v36 = vld [vmem:[%s4769_s6 + $0x170] sm:$0xff] }
   0xd   :  { %v3261_v37 = vld [vmem:[%s4764_s1 + $0x58] sm:$0xff]   ;;  %v3262_v38 = vld [vmem:[%s4764_s1 + $0x60] sm:$0xff]   ;;  %v77_v39 = vld [vmem:[%s4769_s6 + $0x188] sm:$0xff] }
   0xe   :  { %360 = vperm.xlu1 %3248, %v59_v11   ;;  %355 = vperm.xlu0 %3247, %v58_v12   ;;  %v76_v40 = vld [vmem:[%s4769_s6 + $0x180] sm:$0xff]  ;;  %v79_v41 = vld [vmem:[%s4769_s6 + $0x198] sm:$0xff]  ;;  %v78_v42 = vld [vmem:[%s4769_s6 + $0x190] sm:$0xff] }
   0xf   :  { %3096 = vmatmul.mubr.msk.bf16.gmra.mrb[4].mxu0 %vm659_vm0, %v3253_v13  ;;  %v3263_v43 = vld [vmem:[%s4764_s1 + $0x68] sm:$0xff]   ;;  %v3264_v44 = vld [vmem:[%s4764_s1 + $0x70] sm:$0xff]   ;;  %v80_v46 = vld [vmem:[%s4769_s6 + $0x1a0] sm:$0xff] }
  0x10   :  { %3099 = vmatprep.mubr.msk.bf16.mxu0 %vm659_vm0, %v3254_v14  ;;  %v81_v45 = vld [vmem:[%s4769_s6 + $0x1a8] sm:$0xff]  ;;  %v83_v47 = vld [vmem:[%s4769_s6 + $0x1b8] sm:$0xff]  ;;  %v82_v48 = vld [vmem:[%s4769_s6 + $0x1b0] sm:$0xff] }
  0x11   :  { %v3265_v49 = vld [vmem:[%s4764_s1 + $0x78] sm:$0xff]   ;;  %v3266_v50 = vld [vmem:[%s4764_s1 + $0x80] sm:$0xff]   ;;  %v85_v51 = vld [vmem:[%s4769_s6 + $0x1c8] sm:$0xff] }
  0x12   :  { %370 = vperm.xlu1 %3248, %v61_v15   ;;  %365 = vperm.xlu0 %3247, %v60_v16   ;;  %v84_v52 = vld [vmem:[%s4769_s6 + $0x1c0] sm:$0xff]  ;;  %v87_v53 = vld [vmem:[%s4769_s6 + $0x1d8] sm:$0xff]  ;;  %v86_v54 = vld [vmem:[%s4769_s6 + $0x1d0] sm:$0xff] }
  0x13   :  { %v3267_v55 = vld [vmem:[%s4764_s1 + $0x88] sm:$0xff]   ;;  %v3268_v56 = vld [vmem:[%s4764_s1 + $0x90] sm:$0xff]   ;;  %v104_v58 = vld [vmem:[%s4769_s6 + $0x260] sm:$0xff] }
  0x14   :  { %v105_v57 = vld [vmem:[%s4769_s6 + $0x268] sm:$0xff]  ;;  %v88_v60 = vld [vmem:[%s4769_s6 + $0x1e0] sm:$0xff]  ;;  %v3269_v61 = vld [vmem:[%s4764_s1 + $0x98] sm:$0xff]  }
  0x15   :  { %v89_v59 = vld [vmem:[%s4769_s6 + $0x1e8] sm:$0xff]  ;;  %v3270_v62 = vld [vmem:[%s4764_s1 + $0xa0] sm:$0xff]   ;;  %v107_v63 = vld [vmem:[%s4769_s6 + $0x278] sm:$0xff] }
  0x16   :  { %380 = vperm.xlu1 %3248, %v63_v17   ;;  %375 = vperm.xlu0 %3247, %v62_v18   ;;  %v106_v0 = vld [vmem:[%s4769_s6 + $0x270] sm:$0xff]  ;;  %v91_v1 = vld [vmem:[%s4769_s6 + $0x1f8] sm:$0xff]  ;;  %v3271_v4 = vld [vmem:[%s4764_s1 + $0xa8] sm:$0xff]  }
  0x17   :  { %3100 = vmatmul.mubr.msk.bf16.gmra.mrb[8].mxu0 %vm659_vm0, %v3255_v19  ;;  %v90_v3 = vld [vmem:[%s4769_s6 + $0x1f0] sm:$0xff]  ;;  %v109_v6 = vld [vmem:[%s4769_s6 + $0x288] sm:$0xff]  ;;  %v108_v7 = vld [vmem:[%s4769_s6 + $0x280] sm:$0xff] }
  0x18   :  { %3103 = vmatprep.mubr.msk.bf16.mxu0 %vm659_vm0, %v3256_v20  ;;  %v3272_v5 = vld [vmem:[%s4764_s1 + $0xb0] sm:$0xff]   ;;  %v93_v8 = vld [vmem:[%s4769_s6 + $0x208] sm:$0xff]  ;;  %v92_v9 = vld [vmem:[%s4769_s6 + $0x200] sm:$0xff] }
  0x19   :  { %v3273_v10 = vld [vmem:[%s4764_s1 + $0xb8] sm:$0xff]   ;;  %v3274_v11 = vld [vmem:[%s4764_s1 + $0xc0] sm:$0xff]   ;;  %v110_v13 = vld [vmem:[%s4769_s6 + $0x290] sm:$0xff] }
  0x1a   :  { %390 = vperm.xlu1 %3248, %v65_v21   ;;  %385 = vperm.xlu0 %3247, %v64_v22   ;;  %v111_v12 = vld [vmem:[%s4769_s6 + $0x298] sm:$0xff]  ;;  %v94_v15 = vld [vmem:[%s4769_s6 + $0x210] sm:$0xff]  ;;  %v3275_v16 = vld [vmem:[%s4764_s1 + $0xc8] sm:$0xff]  }
  0x1b   :  { %v95_v14 = vld [vmem:[%s4769_s6 + $0x218] sm:$0xff]  ;;  %v3276_v17 = vld [vmem:[%s4764_s1 + $0xd0] sm:$0xff]   ;;  %v113_v18 = vld [vmem:[%s4769_s6 + $0x2a8] sm:$0xff] }
  0x1c   :  { %v112_v19 = vld [vmem:[%s4769_s6 + $0x2a0] sm:$0xff] }
  0x1e   :  { %400 = vperm.xlu1 %3248, %v67_v23   ;;  %395 = vperm.xlu0 %3247, %v66_v24  }
  0x1f   :  { %3104 = vmatmul.mubr.msk.bf16.gmra.mrb[12].mxu0 %vm659_vm0, %v3257_v25 }
  0x20   :  { %3107 = vmatprep.mubr.msk.bf16.mxu0 %vm659_vm0, %v3258_v26 }
  0x22   :  { %410 = vperm.xlu1 %3248, %v69_v27   ;;  %405 = vperm.xlu0 %3247, %v68_v28  }
  0x26   :  { %420 = vperm.xlu1 %3248, %v71_v29   ;;  %415 = vperm.xlu0 %3247, %v70_v30  }
  0x27   :  { %3108 = vmatmul.mubr.msk.bf16.gmra.mrb[16].mxu0 %vm659_vm0, %v3259_v31 }
  0x28   :  { %3111 = vmatprep.mubr.msk.bf16.mxu0 %vm659_vm0, %v3260_v32 }
  0x2a   :  { %430 = vperm.xlu1 %3248, %v73_v33   ;;  %425 = vperm.xlu0 %3247, %v72_v34  }
  0x2e   :  { %440 = vperm.xlu1 %3248, %v75_v35   ;;  %435 = vperm.xlu0 %3247, %v74_v36  }
  0x2f   :  { %3112 = vmatmul.mubr.msk.bf16.gmra.mrb[20].mxu0 %vm659_vm0, %v3261_v37 }
  0x30   :  { %3115 = vmatprep.mubr.msk.bf16.mxu0 %vm659_vm0, %v3262_v38 }
  0x32   :  { %450 = vperm.xlu1 %3248, %v77_v39   ;;  %445 = vperm.xlu0 %3247, %v76_v40  }
  0x36   :  { %460 = vperm.xlu1 %3248, %v79_v41   ;;  %455 = vperm.xlu0 %3247, %v78_v42  }
  0x37   :  { %3116 = vmatmul.mubr.msk.bf16.gmra.mrb[24].mxu0 %vm659_vm0, %v3263_v43 }
  0x38   :  { %3119 = vmatprep.mubr.msk.bf16.mxu0 %vm659_vm0, %v3264_v44 }
  0x3a   :  { %470 = vperm.xlu1 %3248, %v81_v45   ;;  %465 = vperm.xlu0 %3247, %v80_v46  }
  0x3e   :  { %480 = vperm.xlu1 %3248, %v83_v47   ;;  %475 = vperm.xlu0 %3247, %v82_v48  }
  0x3f   :  { %3120 = vmatmul.mubr.msk.bf16.gmra.mrb[28].mxu0 %vm659_vm0, %v3265_v49 }
  0x40   :  { %3123 = vmatprep.mubr.msk.bf16.mxu0 %vm659_vm0, %v3266_v50 }
  0x42   :  { %490 = vperm.xlu1 %3248, %v85_v51   ;;  %485 = vperm.xlu0 %3247, %v84_v52  }
  0x46   :  { %500 = vperm.xlu1 %3248, %v87_v53   ;;  %495 = vperm.xlu0 %3247, %v86_v54  }
  0x47   :  { %3124 = vmatmul.mubr.msk.bf16.gmra.mrb[32].mxu0 %vm659_vm0, %v3267_v55 }
  0x48   :  { %3127 = vmatprep.mubr.msk.bf16.mxu0 %vm659_vm0, %v3268_v56 }
  0x4a   :  { %1372 = vperm.xlu1 %3248, %v105_v57   ;;  %1367 = vperm.xlu0 %3247, %v104_v58  }
  0x4e   :  { %1292 = vperm.xlu1 %3248, %v89_v59   ;;  %1287 = vperm.xlu0 %3247, %v88_v60  }
  0x4f   :  { %3128 = vmatmul.mubr.msk.bf16.gmra.mrb[36].mxu0 %vm659_vm0, %v3269_v61 }
  0x50   :  { %3131 = vmatprep.mubr.msk.bf16.mxu0 %vm659_vm0, %v3270_v62 }
  0x52   :  { %1382 = vperm.xlu1 %3248, %v107_v63   ;;  %1377 = vperm.xlu0 %3247, %v106_v0  }
  0x56   :  { %1302 = vperm.xlu1 %3248, %v91_v1   ;;  %1297 = vperm.xlu0 %3247, %v90_v3  }
  0x57   :  { %3132 = vmatmul.mubr.msk.bf16.gmra.mrb[40].mxu0 %vm659_vm0, %v3271_v4 }
  0x58   :  { %3135 = vmatprep.mubr.msk.bf16.mxu0 %vm659_vm0, %v3272_v5 }
  0x5a   :  { %1392 = vperm.xlu1 %3248, %v109_v6   ;;  %1387 = vperm.xlu0 %3247, %v108_v7  }
  0x5e   :  { %1312 = vperm.xlu1 %3248, %v93_v8   ;;  %1307 = vperm.xlu0 %3247, %v92_v9  }
  0x5f   :  { %3136 = vmatmul.mubr.msk.bf16.gmra.mrb[44].mxu0 %vm659_vm0, %v3273_v10 }
  0x60   :  { %3139 = vmatprep.mubr.msk.bf16.mxu0 %vm659_vm0, %v3274_v11 }
  0x62   :  { %1402 = vperm.xlu1 %3248, %v111_v12   ;;  %1397 = vperm.xlu0 %3247, %v110_v13  }
  0x66   :  { %1322 = vperm.xlu1 %3248, %v95_v14   ;;  %1317 = vperm.xlu0 %3247, %v94_v15  }
  0x67   :  { %3140 = vmatmul.mubr.msk.bf16.gmra.mrb[48].mxu0 %vm659_vm0, %v3275_v16 }
  0x68   :  { %12 = vsyncpa [#allocation3], 0  ;;  %3143 = vmatprep.mubr.msk.bf16.mxu0 %vm659_vm0, %v3276_v17  ;;  %v97_v20 = vld [vmem:[%s4769_s6 + $0x228] sm:$0xff]  ;;  %v96_v21 = vld [vmem:[%s4769_s6 + $0x220] sm:$0xff]  ;;  %vm1785_vm1 = vcmask 261120   ;;  %vm2466_vm2 = vcmask 523264  }
  0x69   :  { %v3277_v22 = vld [vmem:[%s4764_s1 + $0xd8] sm:$0xff]   ;;  %v3278_v23 = vld [vmem:[%s4764_s1 + $0xe0] sm:$0xff]   ;;  %v114_v25 = vld [vmem:[%s4769_s6 + $0x2b0] sm:$0xff]  ;;  %vm3506_vm3 = vmmov 0   ;;  %vm2671_vm4 = vcmask 785408   ;;  %s3507_s20 = smov [#allocation2]  }
  0x6a   :  { %1412 = vperm.xlu1 %3248, %v113_v18   ;;  %1407 = vperm.xlu0 %3247, %v112_v19   ;;  %v115_v24 = vld [vmem:[%s4769_s6 + $0x2b8] sm:$0xff]  ;;  %v98_v27 = vld [vmem:[%s4769_s6 + $0x230] sm:$0xff]  ;;  %v3279_v28 = vld [vmem:[%s4764_s1 + $0xe8] sm:$0xff]   ;;  %s2771_s1 = sshll.u32 %s3507_s20, 4  ;;  %s2772_s1 = int_to_ptr.vmem [resolvable:$true] %s2771_s1 }
  0x6b   :  { %v99_v26 = vld [vmem:[%s4769_s6 + $0x238] sm:$0xff]  ;;  %v117_v29 = vld [vmem:[%s4769_s6 + $0x2c8] sm:$0xff]  ;;  %v116_v30 = vld [vmem:[%s4769_s6 + $0x2c0] sm:$0xff]  ;;  %s3480_s21 = scalar_lea.vmem %s2772_s1, 16  ;;  %p3485_p1 = scmp.lt.s32.totalorder %s2772_s1, %s2772_s1 }
  0x6c   :  { %v101_v31 = vld [vmem:[%s4769_s6 + $0x248] sm:$0xff]  ;;  %v100_v32 = vld [vmem:[%s4769_s6 + $0x240] sm:$0xff]  ;;  %v119_v33 = vld [vmem:[%s4769_s6 + $0x2d8] sm:$0xff]  ;;  %p3481_p0 = scmp.ne.s32.totalorder %s2772_s1, %s3480_s21 }
  0x6d   :  { %v118_v34 = vld [vmem:[%s4769_s6 + $0x2d0] sm:$0xff]  ;;  %v103_v37 = vld [vmem:[%s4769_s6 + $0x258] sm:$0xff]  ;;  %v121_v41 = vld [vmem:[%s4769_s6 + $0x2e8] sm:$0xff] }
  0x6e   :  { %1332 = vperm.xlu1 %3248, %v97_v20   ;;  %1327 = vperm.xlu0 %3247, %v96_v21   ;;  %v102_v38 = vld [vmem:[%s4769_s6 + $0x250] sm:$0xff]  ;;  %v120_v42 = vld [vmem:[%s4769_s6 + $0x2e0] sm:$0xff]  ;;  %v123_v45 = vld [vmem:[%s4769_s6 + $0x2f8] sm:$0xff] }
  0x6f   :  { %3144 = vmatmul.mubr.msk.bf16.gmra.mrb[52].mxu0 %vm659_vm0, %v3277_v22  ;;  %v122_v46 = vld [vmem:[%s4769_s6 + $0x2f0] sm:$0xff]  ;;  %v125_v49 = vld [vmem:[%s4769_s6 + $0x308] sm:$0xff]  ;;  %v124_v50 = vld [vmem:[%s4769_s6 + $0x300] sm:$0xff] }
  0x70   :  { %3147 = vmatprep.mubr.msk.bf16.mxu0 %vm659_vm0, %v3278_v23  ;;  %v127_v53 = vld [vmem:[%s4769_s6 + $0x318] sm:$0xff]  ;;  %v126_v54 = vld [vmem:[%s4769_s6 + $0x310] sm:$0xff]  ;;  %v29_v57 = vld [vmem:[%s4769_s6 + $0x8] sm:$0xff] }
  0x71   :  { %v28_v58 = vld [vmem:[%s4769_s6] sm:$0xff]  ;;  %v31_v61 = vld [vmem:[%s4769_s6 + $0x18] sm:$0xff]  ;;  %v30_v62 = vld [vmem:[%s4769_s6 + $0x10] sm:$0xff] }
  0x72   :  { %1422 = vperm.xlu1 %3248, %v115_v24   ;;  %1417 = vperm.xlu0 %3247, %v114_v25   ;;  %v33_v1 = vld [vmem:[%s4769_s6 + $0x28] sm:$0xff]  ;;  %v32_v3 = vld [vmem:[%s4769_s6 + $0x20] sm:$0xff]  ;;  %v35_v6 = vld [vmem:[%s4769_s6 + $0x38] sm:$0xff] }
  0x73   :  { %v34_v7 = vld [vmem:[%s4769_s6 + $0x30] sm:$0xff]  ;;  %v37_v10 = vld [vmem:[%s4769_s6 + $0x48] sm:$0xff]  ;;  %v36_v11 = vld [vmem:[%s4769_s6 + $0x40] sm:$0xff] }
  0x74   :  { %v45_v14 = vld [vmem:[%s4769_s6 + $0x88] sm:$0xff]  ;;  %v44_v15 = vld [vmem:[%s4769_s6 + $0x80] sm:$0xff]  ;;  %v39_v18 = vld [vmem:[%s4769_s6 + $0x58] sm:$0xff] }
  0x75   :  { %v38_v19 = vld [vmem:[%s4769_s6 + $0x50] sm:$0xff]  ;;  %v47_v22 = vld [vmem:[%s4769_s6 + $0x98] sm:$0xff] }
  0x76   :  { %1342 = vperm.xlu1 %3248, %v99_v26   ;;  %1337 = vperm.xlu0 %3247, %v98_v27   ;;  %v46_v23 = vld [vmem:[%s4769_s6 + $0x90] sm:$0xff]  ;;  %v41_v26 = vld [vmem:[%s4769_s6 + $0x68] sm:$0xff]  ;;  %v40_v27 = vld [vmem:[%s4769_s6 + $0x60] sm:$0xff] }
  0x77   :  { %3148 = vmatmul.mubr.msk.bf16.gmra.mrb[56].mxu0 %vm659_vm0, %v3279_v28 }
  0x7a   :  { %1432 = vperm.xlu1 %3248, %v117_v29   ;;  %1427 = vperm.xlu0 %3247, %v116_v30   ;;  %v49_v30 = vld [vmem:[%s4769_s6 + $0xa8] sm:$0xff] }
  0x7e   :  { %1352 = vperm.xlu1 %3248, %v101_v31   ;;  %1347 = vperm.xlu0 %3247, %v100_v32   ;;  %v48_v31 = vld [vmem:[%s4769_s6 + $0xa0] sm:$0xff] }
  0x81   :  { %v3872_v35 = vpop.permute.xlu1 %335  ;;  %v3874_v36 = vpop.permute.xlu0 %325 }
  0x82   :  { %1442 = vperm.xlu1 %3248, %v119_v33   ;;  %1437 = vperm.xlu0 %3247, %v118_v34   ;;  %v43_v34 = vld [vmem:[%s4769_s6 + $0x78] sm:$0xff] }
  0x85   :  { %v3882_v39 = vpop.permute.xlu1 %340  ;;  %v3884_v40 = vpop.permute.xlu0 %330 }
  0x86   :  { %1362 = vperm.xlu1 %3248, %v103_v37   ;;  %1357 = vperm.xlu0 %3247, %v102_v38   ;;  %v42_v37 = vld [vmem:[%s4769_s6 + $0x70] sm:$0xff] }
  0x89   :  { %v3892_v43 = vpop.permute.xlu1 %350  ;;  %v3894_v44 = vpop.permute.xlu0 %345 }
  0x8a   :  { %1452 = vperm.xlu1 %3248, %v121_v41   ;;  %1447 = vperm.xlu0 %3247, %v120_v42   ;;  %v51_v42 = vld [vmem:[%s4769_s6 + $0xb8] sm:$0xff] }
  0x8d   :  { %v3902_v47 = vpop.permute.xlu1 %360  ;;  %v3904_v48 = vpop.permute.xlu0 %355 }
  0x8e   :  { %1462 = vperm.xlu1 %3248, %v123_v45   ;;  %1457 = vperm.xlu0 %3247, %v122_v46   ;;  %v50_v45 = vld [vmem:[%s4769_s6 + $0xb0] sm:$0xff] }
  0x91   :  { %v3912_v51 = vpop.permute.xlu1 %370  ;;  %v3914_v52 = vpop.permute.xlu0 %365 }
  0x92   :  { %1472 = vperm.xlu1 %3248, %v125_v49   ;;  %1467 = vperm.xlu0 %3247, %v124_v50   ;;  %v129_v50 = vld [vmem:[%s4769_s6 + $0x328] sm:$0xff] }
  0x95   :  { %v3922_v55 = vpop.permute.xlu1 %380  ;;  %v3924_v56 = vpop.permute.xlu0 %375 }
  0x96   :  { %1482 = vperm.xlu1 %3248, %v127_v53   ;;  %1477 = vperm.xlu0 %3247, %v126_v54   ;;  %v128_v53 = vld [vmem:[%s4769_s6 + $0x320] sm:$0xff] }
  0x99   :  { %v3932_v59 = vpop.permute.xlu1 %390  ;;  %v3934_v60 = vpop.permute.xlu0 %385 }
  0x9a   :  { %210 = vperm.xlu1 %3248, %v29_v57   ;;  %205 = vperm.xlu0 %3247, %v28_v58   ;;  %v131_v58 = vld [vmem:[%s4769_s6 + $0x338] sm:$0xff] }
  0x9d   :  { %v3942_v63 = vpop.permute.xlu1 %400  ;;  %v3944_v0 = vpop.permute.xlu0 %395 }
  0x9e   :  { %220 = vperm.xlu1 %3248, %v31_v61   ;;  %215 = vperm.xlu0 %3247, %v30_v62   ;;  %v130_v61 = vld [vmem:[%s4769_s6 + $0x330] sm:$0xff] }
  0xa1   :  { %v3952_v4 = vpop.permute.xlu1 %410  ;;  %v3954_v5 = vpop.permute.xlu0 %405 }
  0xa2   :  { %230 = vperm.xlu1 %3248, %v33_v1   ;;  %225 = vperm.xlu0 %3247, %v32_v3   ;;  %v133_v3 = vld [vmem:[%s4769_s6 + $0x348] sm:$0xff] }
  0xa5   :  { %v3962_v8 = vpop.permute.xlu1 %420  ;;  %v3964_v9 = vpop.permute.xlu0 %415 }
  0xa6   :  { %240 = vperm.xlu1 %3248, %v35_v6   ;;  %235 = vperm.xlu0 %3247, %v34_v7   ;;  %v132_v6 = vld [vmem:[%s4769_s6 + $0x340] sm:$0xff] }
  0xa9   :  { %v3972_v12 = vpop.permute.xlu1 %430  ;;  %v3974_v13 = vpop.permute.xlu0 %425 }
  0xaa   :  { %250 = vperm.xlu1 %3248, %v37_v10   ;;  %245 = vperm.xlu0 %3247, %v36_v11   ;;  %v135_v11 = vld [vmem:[%s4769_s6 + $0x358] sm:$0xff] }
  0xad   :  { %v3982_v16 = vpop.permute.xlu1 %440  ;;  %v3984_v17 = vpop.permute.xlu0 %435 }
  0xae   :  { %290 = vperm.xlu1 %3248, %v45_v14   ;;  %285 = vperm.xlu0 %3247, %v44_v15   ;;  %v134_v14 = vld [vmem:[%s4769_s6 + $0x350] sm:$0xff] }
  0xb1   :  { %v3992_v20 = vpop.permute.xlu1 %450  ;;  %v3994_v21 = vpop.permute.xlu0 %445 }
  0xb2   :  { %260 = vperm.xlu1 %3248, %v39_v18   ;;  %255 = vperm.xlu0 %3247, %v38_v19   ;;  %v3282_v19 = vld [vmem:[%s4765_s2 + $0x4] ss:$12 sps:$4 sm:$0xff]  }
  0xb3   :  { %1878 = vmatprep.mubr.bf16.mxu1 %v3282_v19 }
  0xb5   :  { %v4002_v24 = vpop.permute.xlu1 %460  ;;  %v4004_v25 = vpop.permute.xlu0 %455 }
  0xb6   :  { %300 = vperm.xlu1 %3248, %v47_v22   ;;  %295 = vperm.xlu0 %3247, %v46_v23   ;;  %v137_v22 = vld [vmem:[%s4769_s6 + $0x368] sm:$0xff]  ;;  %v136_v23 = vld [vmem:[%s4769_s6 + $0x360] sm:$0xff] }
  0xb9   :  { %v4012_v28 = vpop.permute.xlu1 %470  ;;  %v4014_v29 = vpop.permute.xlu0 %465 }
  0xba   :  { %4773 = vst [vmem:[#allocation5_spill] sm:$0xff] %v4012_v28  ;;  %4774 = vst [vmem:[#allocation6_spill] sm:$0xff] %v4014_v29  ;;  %270 = vperm.xlu1 %3248, %v41_v26   ;;  %265 = vperm.xlu0 %3247, %v40_v27  }
  0xbd   :  { %v4022_v32 = vpop.permute.xlu1 %480  ;;  %v4024_v33 = vpop.permute.xlu0 %475 }
  0xbe   :  { %4775 = vst [vmem:[#allocation7_spill] sm:$0xff] %v4022_v32  ;;  %4776 = vst [vmem:[#allocation8_spill] sm:$0xff] %v4024_v33  ;;  %310 = vperm.xlu1 %3248, %v49_v30   ;;  %305 = vperm.xlu0 %3247, %v48_v31  }
  0xc1   :  { %v4032_v38 = vpop.permute.xlu1 %490  ;;  %v4034_v41 = vpop.permute.xlu0 %485 }
  0xc2   :  { %4777 = vst [vmem:[#allocation9_spill] sm:$0xff] %v4032_v38  ;;  %4778 = vst [vmem:[#allocation10_spill] sm:$0xff] %v4034_v41  ;;  %280 = vperm.xlu1 %3248, %v43_v34   ;;  %275 = vperm.xlu0 %3247, %v42_v37   ;;  %v139_v34 = vld [vmem:[%s4769_s6 + $0x378] sm:$0xff]  ;;  %v138_v37 = vld [vmem:[%s4769_s6 + $0x370] sm:$0xff] }
  0xc5   :  { %v4042_v46 = vpop.permute.xlu1 %500  ;;  %v4044_v49 = vpop.permute.xlu0 %495 }
  0xc6   :  { %4779 = vst [vmem:[#allocation11_spill] sm:$0xff] %v4042_v46  ;;  %4780 = vst [vmem:[#allocation12_spill] sm:$0xff] %v4044_v49  ;;  %320 = vperm.xlu1 %3248, %v51_v42   ;;  %315 = vperm.xlu0 %3247, %v50_v45   ;;  %v3286_v45 = vld [vmem:[%s4765_s2 + $0x8] ss:$12 sps:$4 sm:$0xff]  }
  0xc7   :  { %3155 = vmatprep.mubr.msk.bf16.mxu0 %vm1785_vm1, %v3286_v45 }
  0xc9   :  { %v4052_v54 = vpop.permute.xlu1 %1372  ;;  %v4054_v57 = vpop.permute.xlu0 %1367 }
  0xca   :  { %4781 = vst [vmem:[#allocation13_spill] sm:$0xff] %v4052_v54  ;;  %4782 = vst [vmem:[#allocation14_spill] sm:$0xff] %v4054_v57  ;;  %2323 = vperm.xlu1 %3248, %v129_v50   ;;  %2318 = vperm.xlu0 %3247, %v128_v53  }
  0xcd   :  { %v4062_v62 = vpop.permute.xlu1 %1292  ;;  %v4064_v1 = vpop.permute.xlu0 %1287 }
  0xce   :  { %4783 = vst [vmem:[#allocation15_spill] sm:$0xff] %v4062_v62  ;;  %4784 = vst [vmem:[#allocation16_spill] sm:$0xff] %v4064_v1  ;;  %2333 = vperm.xlu1 %3248, %v131_v58   ;;  %2328 = vperm.xlu0 %3247, %v130_v61   ;;  %v140_v61 = vld [vmem:[%s4769_s6 + $0x380] sm:$0x1] }
  0xd1   :  { %v4072_v7 = vpop.permute.xlu1 %1382  ;;  %v4074_v10 = vpop.permute.xlu0 %1377 }
  0xd2   :  { %4785 = vst [vmem:[#allocation17_spill] sm:$0xff] %v4072_v7  ;;  %4786 = vst [vmem:[#allocation18_spill] sm:$0xff] %v4074_v10  ;;  %2343 = vperm.xlu1 %3248, %v133_v3   ;;  %2338 = vperm.xlu0 %3247, %v132_v6  }
  0xd5   :  { %v4082_v15 = vpop.permute.xlu1 %1302  ;;  %v4084_v18 = vpop.permute.xlu0 %1297 }
  0xd6   :  { %4787 = vst [vmem:[#allocation19_spill] sm:$0xff] %v4082_v15  ;;  %4788 = vst [vmem:[#allocation20_spill] sm:$0xff] %v4084_v18  ;;  %2353 = vperm.xlu1 %3248, %v135_v11   ;;  %2348 = vperm.xlu0 %3247, %v134_v14  }
  0xd9   :  { %v4095_v26 = vpop.permute.xlu1 %1392  ;;  %v4097_v27 = vpop.permute.xlu0 %1387 }
  0xda   :  { %4789 = vst [vmem:[#allocation21_spill] sm:$0xff] %v4095_v26  ;;  %4790 = vst [vmem:[#allocation22_spill] sm:$0xff] %v4097_v27  ;;  %v4099_v30 = vpop.f32.mrb[0].mxu0  ;;  %2363 = vperm.xlu1 %3248, %v137_v22   ;;  %2358 = vperm.xlu0 %3247, %v136_v23  }
  0xdb   :  { %v4101_v31 = vpop.f32.mrb[1].mxu0 }
  0xdc   :  { %v4109_v42 = vpop.f32.mrb[2].mxu0 }
  0xdd   :  { %v4114_v50 = vpop.f32.mrb[3].mxu0  ;;  %v4116_v53 = vpop.permute.xlu1 %1312 }
  0xde   :  { %4791 = vst [vmem:[#allocation23_spill] sm:$0xff] %v4116_v53  ;;  %v4118_v58 = vpop.permute.xlu0 %1307  ;;  %2373 = vperm.xlu1 %3248, %v139_v34   ;;  %2368 = vperm.xlu0 %3247, %v138_v37  }
  0xdf   :  { %4792 = vst [vmem:[#allocation24_spill] sm:$0xff] %v4118_v58 }
  0xe1   :  { %v4124_v3 = vpop.permute.xlu1 %1402 }
  0xe2   :  { %4793 = vst [vmem:[#allocation25_spill] sm:$0xff] %v4124_v3  ;;  %v4126_v6 = vpop.permute.xlu0 %1397  ;;  %v4128_v11 = vpop.f32.mrb[4].mxu0  ;;  %2760 = vperm.xlu0 %3247, %v140_v61  }
  0xe3   :  { %4794 = vst [vmem:[#allocation26_spill] sm:$0xff] %v4126_v6  ;;  %v4130_v14 = vpop.f32.mrb[5].mxu0 }
  0xe4   :  { %v4132_v19 = vpop.f32.mrb[6].mxu0 }
  0xe5   :  { %v4134_v22 = vpop.f32.mrb[7].mxu0  ;;  %v4136_v23 = vpop.permute.xlu1 %1322 }
  0xe6   :  { %4795 = vst [vmem:[#allocation27_spill] sm:$0xff] %v4136_v23  ;;  %v4138_v34 = vpop.permute.xlu0 %1317 }
  0xe7   :  { %4796 = vst [vmem:[#allocation28_spill] sm:$0xff] %v4138_v34 }
  0xe9   :  { %v4140_v37 = vpop.permute.xlu1 %1412 }
  0xea   :  { %4797 = vst [vmem:[#allocation29_spill] sm:$0xff] %v4140_v37  ;;  %v4142_v45 = vpop.permute.xlu0 %1407  ;;  %v4144_v2 = vpop.f32.mrb[8].mxu0 }
  0xeb   :  { %4798 = vst [vmem:[#allocation30_spill] sm:$0xff] %v4142_v45  ;;  %v4146_v3 = vpop.f32.mrb[9].mxu0 }
  0xec   :  { %v4148_v6 = vpop.f32.mrb[10].mxu0 }
  0xed   :  { %v4150_v61 = vpop.f32.mrb[11].mxu0  ;;  %v4152_v26 = vpop.permute.xlu1 %1332 }
  0xee   :  { %4799 = vst [vmem:[#allocation31_spill] sm:$0xff] %v4152_v26  ;;  %v4154_v27 = vpop.permute.xlu0 %1327 }
  0xef   :  { %4800 = vst [vmem:[#allocation32_spill] sm:$0xff] %v4154_v27 }
  0xf1   :  { %v4156_v7 = vpop.permute.xlu1 %1422 }
  0xf2   :  { %4801 = vst [vmem:[#allocation33_spill] sm:$0xff] %v4156_v7  ;;  %v4158_v10 = vpop.permute.xlu0 %1417  ;;  %v4160_v54 = vpop.f32.mrb[12].mxu0 }
  0xf3   :  { %4802 = vst [vmem:[#allocation34_spill] sm:$0xff] %v4158_v10  ;;  %4803 = vst [vmem:[#allocation35_spill] sm:$0xff] %v4160_v54  ;;  %v4162_v37 = vpop.f32.mrb[13].mxu0 }
  0xf4   :  { %v4164_v45 = vpop.f32.mrb[14].mxu0 }
  0xf5   :  { %4804 = vst [vmem:[#allocation36_spill] sm:$0xff] %v4164_v45  ;;  %v4166_v57 = vpop.f32.mrb[15].mxu0  ;;  %v4168_v23 = vpop.permute.xlu1 %1342 }
  0xf6   :  { %4805 = vst [vmem:[#allocation37_spill] sm:$0xff] %v4168_v23  ;;  %v4170_v34 = vpop.permute.xlu0 %1337 }
  0xf7   :  { %4806 = vst [vmem:[#allocation38_spill] sm:$0xff] %v4170_v34 }
  0xf9   :  { %v4172_v53 = vpop.permute.xlu1 %1432 }
  0xfa   :  { %4807 = vst [vmem:[#allocation39_spill] sm:$0xff] %v4172_v53  ;;  %v4174_v26 = vpop.permute.xlu0 %1427  ;;  %v4176_v27 = vpop.f32.mrb[16].mxu0 }
  0xfb   :  { %4808 = vst [vmem:[#allocation40_spill] sm:$0xff] %v4174_v26  ;;  %v4178_v7 = vpop.f32.mrb[17].mxu0 }
  0xfc   :  { %v4180_v10 = vpop.f32.mrb[18].mxu0 }
  0xfd   :  { %v4182_v58 = vpop.f32.mrb[19].mxu0  ;;  %v4184_v15 = vpop.permute.xlu1 %1352 }
  0xfe   :  { %4809 = vst [vmem:[#allocation41_spill] sm:$0xff] %v4184_v15  ;;  %v4186_v62 = vpop.permute.xlu0 %1347 }
  0xff   :  { %4810 = vst [vmem:[#allocation42_spill] sm:$0xff] %v4186_v62 }
 0x101   :  { %v4188_v18 = vpop.permute.xlu1 %1442 }
 0x102   :  { %4811 = vst [vmem:[#allocation43_spill] sm:$0xff] %v4188_v18  ;;  %v4190_v23 = vpop.permute.xlu0 %1437  ;;  %v4192_v34 = vpop.f32.mrb[20].mxu0 }
 0x103   :  { %4812 = vst [vmem:[#allocation44_spill] sm:$0xff] %v4190_v23  ;;  %4813 = vst [vmem:[#allocation45_spill] sm:$0xff] %v4192_v34  ;;  %v4194_v53 = vpop.f32.mrb[21].mxu0 }
 0x104   :  { %v4196_v26 = vpop.f32.mrb[22].mxu0 }
 0x105   :  { %4814 = vst [vmem:[#allocation46_spill] sm:$0xff] %v4196_v26  ;;  %v4198_v1 = vpop.f32.mrb[23].mxu0  ;;  %v4200_v38 = vpop.permute.xlu1 %1362 }
 0x106   :  { %4815 = vst [vmem:[#allocation47_spill] sm:$0xff] %v4200_v38  ;;  %v4202_v46 = vpop.permute.xlu0 %1357 }
 0x107   :  { %4816 = vst [vmem:[#allocation48_spill] sm:$0xff] %v4202_v46 }
 0x109   :  { %v4204_v41 = vpop.permute.xlu1 %1452 }
 0x10a   :  { %4817 = vst [vmem:[#allocation49_spill] sm:$0xff] %v4204_v41  ;;  %v4206_v15 = vpop.permute.xlu0 %1447  ;;  %v3117_v62 = vpop.f32.mrb[24].mxu0 }
 0x10b   :  { %4818 = vst [vmem:[#allocation50_spill] sm:$0xff] %v4206_v15  ;;  %v889_v18 = vadd.f32 %v3117_v62, %v3872_v35  ;;  %v880_v23 = vpop.f32.mrb[25].mxu0 }
 0x10c   :  { %v881_v49 = vadd.f32 %v880_v23, %v3874_v36  ;;  %v3118_v34 = vpop.f32.mrb[26].mxu0 }
 0x10d   :  { %v892_v28 = vadd.f32 %v3118_v34, %v3882_v39  ;;  %v883_v26 = vpop.f32.mrb[27].mxu0  ;;  %v4211_v32 = vpop.permute.xlu1 %1462  ;;  %v1153_v46 = vmax.f32 %v889_v18, 0.0 }
 0x10e   :  { %4819 = vst [vmem:[#allocation51_spill] sm:$0xff] %v4211_v32  ;;  %v884_v38 = vadd.f32 %v883_v26, %v3884_v40  ;;  %v4214_v29 = vpop.permute.xlu0 %1457  ;;  %v1151_v33 = vmax.f32 %v881_v49, 0.0 }
 0x10f   :  { %v1154_v41 = vmax.f32 %v892_v28, 0.0 }
 0x110   :  { %v1152_v15 = vmax.f32 %v884_v38, 0.0  ;;  %v4821_v38 = vmov 0  }
 0x111   :  { %v1188_v54 = vpack.c.bf16 %v1154_v41, %v1153_v46  ;;  %v4216_v45 = vpop.permute.xlu1 %1472 }
 0x112   :  { %v4218_v35 = vpop.permute.xlu0 %1467  ;;  %v3121_v36 = vpop.f32.mrb[28].mxu0  ;;  %v1187_v62 = vpack.c.bf16 %v1152_v15, %v1151_v33 }
 0x113   :  { %v905_v39 = vadd.f32 %v3121_v36, %v3904_v48  ;;  %v896_v23 = vpop.f32.mrb[29].mxu0 }
 0x114   :  { %v897_v34 = vadd.f32 %v896_v23, %v3894_v44  ;;  %v3122_v32 = vpop.f32.mrb[30].mxu0  ;;  %1847 = vmatpush1.bf16.msra.mxu1 %v1187_v62 }
 0x115   :  { %v908_v40 = vadd.f32 %v3122_v32, %v3902_v47  ;;  %v899_v18 = vpop.f32.mrb[31].mxu0  ;;  %v4223_v28 = vpop.permute.xlu1 %1482  ;;  %1848 = vmatprep.subr.bf16.mxu1 %v4821_v38  ;;  %v1157_v49 = vmax.f32 %v905_v39, 0.0 }
 0x116   :  { %4820 = vst [vmem:[#allocation52_spill] sm:$0xff] %v4223_v28  ;;  %v900_v41 = vadd.f32 %v899_v18, %v3892_v43  ;;  %v4227_v46 = vpop.permute.xlu0 %1477  ;;  %v1155_v15 = vmax.f32 %v897_v34, 0.0 }
 0x117   :  { %v1158_v33 = vmax.f32 %v908_v40, 0.0 }
 0x118   :  { %v1156_v48 = vmax.f32 %v900_v41, 0.0  ;;  %1849 = vmatpush1.bf16.msra.mxu1 %v1188_v54 }
 0x119   :  { %v1190_v26 = vpack.c.bf16 %v1158_v33, %v1157_v49  ;;  %v211_v44 = vpop.permute.xlu1 %210  ;;  %1850 = vmatprep.subr.bf16.mxu1 %v4821_v38 }
 0x11a   :  { %v1189_v36 = vpack.c.bf16 %v1156_v48, %v1155_v15  ;;  %v788_v47 = vadd.f32 %v4114_v50, %v211_v44  ;;  %v206_v32 = vpop.permute.xlu0 %205  ;;  %v3125_v62 = vpop.f32.mrb[32].mxu0 }
 0x11b   :  { %v785_v23 = vadd.f32 %v4101_v31, %v206_v32  ;;  %v921_v43 = vadd.f32 %v3125_v62, %v3924_v56  ;;  %v912_v18 = vpop.f32.mrb[33].mxu0 }
 0x11c   :  { %v2841_v28 = vmul.f32 -1.442695, %v788_v47  ;;  %v913_v39 = vadd.f32 %v912_v18, %v3914_v52  ;;  %v3126_v34 = vpop.f32.mrb[34].mxu0  ;;  %1851 = vmatpush1.bf16.msra.mxu1 %v1189_v36 }
 0x11d   :  { %v2840_v54 = vmul.f32 -1.442695, %v785_v23  ;;  %v924_v40 = vadd.f32 %v3126_v34, %v3922_v55  ;;  %v915_v41 = vpop.f32.mrb[35].mxu0  ;;  %v221_v49 = vpop.permute.xlu1 %220  ;;  %1852 = vmatprep.subr.bf16.mxu1 %v4821_v38  ;;  %v1161_v56 = vmax.f32 %v921_v43, 0.0 }
 0x11e   :  { %3384 = vpow2.f32 %v2841_v28  ;;  %v916_v50 = vadd.f32 %v915_v41, %v3912_v51  ;;  %v796_v31 = vadd.f32 %v4109_v42, %v221_v49  ;;  %v216_v33 = vpop.permute.xlu0 %215  ;;  %v1159_v48 = vmax.f32 %v913_v39, 0.0 }
 0x11f   :  { %3386 = vpow2.f32 %v2840_v54  ;;  %v1162_v15 = vmax.f32 %v924_v40, 0.0  ;;  %v793_v52 = vadd.f32 %v4099_v30, %v216_v33 }
 0x120   :  { %v1160_v44 = vmax.f32 %v916_v50, 0.0  ;;  %v2843_v36 = vmul.f32 -1.442695, %v796_v31  ;;  %1853 = vmatpush1.bf16.msra.mxu1 %v1190_v26 }
 0x121   :  { %v1192_v55 = vpack.c.bf16 %v1162_v15, %v1161_v56  ;;  %v2842_v47 = vmul.f32 -1.442695, %v793_v52  ;;  %v231_v32 = vpop.permute.xlu1 %230  ;;  %1854 = vmatprep.subr.bf16.mxu1 %v4821_v38 }
 0x122   :  { %v1191_v28 = vpack.c.bf16 %v1160_v44, %v1159_v48  ;;  %3388 = vpow2.f32 %v2843_v36  ;;  %v804_v51 = vadd.f32 %v4134_v22, %v231_v32  ;;  %v226_v42 = vpop.permute.xlu0 %225  ;;  %v3129_v62 = vpop.f32.mrb[36].mxu0 }
 0x123   :  { %3390 = vpow2.f32 %v2842_v47  ;;  %v801_v23 = vadd.f32 %v4130_v14, %v226_v42  ;;  %v937_v30 = vadd.f32 %v3129_v62, %v3944_v0  ;;  %v928_v43 = vpop.f32.mrb[37].mxu0 }
 0x124   :  { %v2845_v18 = vmul.f32 -1.442695, %v804_v51  ;;  %v929_v26 = vadd.f32 %v928_v43, %v3934_v60  ;;  %v3130_v39 = vpop.f32.mrb[38].mxu0  ;;  %1855 = vmatpush1.bf16.msra.mxu1 %v1191_v28 }
 0x125   :  { %v2844_v34 = vmul.f32 -1.442695, %v801_v23  ;;  %v940_v54 = vadd.f32 %v3130_v39, %v3942_v63  ;;  %v931_v40 = vpop.f32.mrb[39].mxu0  ;;  %v241_v41 = vpop.permute.xlu1 %240  ;;  %1856 = vmatprep.subr.bf16.mxu1 %v4821_v38  ;;  %v1165_v0 = vmax.f32 %v937_v30, 0.0 }
 0x126   :  { %3392 = vpow2.f32 %v2845_v18  ;;  %v932_v22 = vadd.f32 %v931_v40, %v3932_v59  ;;  %v812_v14 = vadd.f32 %v4132_v19, %v241_v41  ;;  %v236_v49 = vpop.permute.xlu0 %235  ;;  %v1163_v33 = vmax.f32 %v929_v26, 0.0 }
 0x127   :  { %3394 = vpow2.f32 %v2844_v34  ;;  %v1166_v50 = vmax.f32 %v940_v54, 0.0  ;;  %v809_v60 = vadd.f32 %v4128_v11, %v236_v49 }
 0x128   :  { %v3385_v31 = vpop.eup %3384  ;;  %v1164_v56 = vmax.f32 %v932_v22, 0.0  ;;  %v2847_v15 = vmul.f32 -1.442695, %v812_v14  ;;  %1857 = vmatpush1.bf16.msra.mxu1 %v1192_v55 }
 0x129   :  { %v3387_v63 = vpop.eup %3386  ;;  %v1072_v52 = vadd.f32 1.0, %v3385_v31  ;;  %v1194_v48 = vpack.c.bf16 %v1166_v50, %v1165_v0  ;;  %v2846_v44 = vmul.f32 -1.442695, %v809_v60  ;;  %v251_v36 = vpop.permute.xlu1 %250  ;;  %1858 = vmatprep.subr.bf16.mxu1 %v4821_v38 }
 0x12a   :  { %v1071_v59 = vadd.f32 1.0, %v3387_v63  ;;  %v1193_v19 = vpack.c.bf16 %v1164_v56, %v1163_v33  ;;  %3396 = vpow2.f32 %v2847_v15  ;;  %v820_v47 = vadd.f32 %v4150_v61, %v251_v36  ;;  %v246_v32 = vpop.permute.xlu0 %245  ;;  %v3133_v28 = vpop.f32.mrb[40].mxu0 }
 0x12b   :  { %3398 = vrcp.f32 %v1072_v52  ;;  %v817_v11 = vadd.f32 %v4146_v3, %v246_v32  ;;  %v944_v51 = vpop.f32.mrb[41].mxu0  ;;  %v953_v62 = vadd.f32 %v3133_v28, %v3964_v9 }
 0x12c   :  { %v3389_v42 = vpop.eup %3388  ;;  %3400 = vrcp.f32 %v1071_v59  ;;  %v2849_v55 = vmul.f32 -1.442695, %v820_v47  ;;  %v945_v23 = vadd.f32 %v944_v51, %v3954_v5  ;;  %v3134_v30 = vpop.f32.mrb[42].mxu0  ;;  %1859 = vmatpush1.bf16.msra.mxu1 %v1193_v19 }
 0x12d   :  { %v3391_v43 = vpop.eup %3390  ;;  %v1074_v18 = vadd.f32 1.0, %v3389_v42  ;;  %3402 = vpow2.f32 %v2846_v44  ;;  %v2848_v26 = vmul.f32 -1.442695, %v817_v11  ;;  %v947_v61 = vpop.f32.mrb[43].mxu0  ;;  %1860 = vmatprep.subr.bf16.mxu1 %v4821_v38  ;;  %v956_v3 = vadd.f32 %v3134_v30, %v3962_v8 }
 0x12e   :  { %v291_v39 = vpop.permute.xlu1 %290  ;;  %v1073_v34 = vadd.f32 1.0, %v3391_v43  ;;  %3404 = vpow2.f32 %v2849_v55  ;;  %v286_v54 = vpop.permute.xlu0 %285  ;;  %v948_v9 = vadd.f32 %v947_v61, %v3952_v4  ;;  %v1169_v41 = vmax.f32 %v953_v62, 0.0 }
 0x12f   :  { %3406 = vrcp.f32 %v1074_v18  ;;  %v852_v5 = vadd.f32 %v4182_v58, %v291_v39  ;;  %v1167_v22 = vmax.f32 %v945_v23, 0.0  ;;  %v1170_v14 = vmax.f32 %v956_v3, 0.0 }
 0x130   :  { %v3393_v40 = vpop.eup %3392  ;;  %3408 = vrcp.f32 %v1073_v34  ;;  %1861 = vmatpush1.bf16.msra.mxu1 %v1194_v48  ;;  %v1168_v50 = vmax.f32 %v948_v9, 0.0  ;;  %v849_v60 = vadd.f32 %v4178_v7, %v286_v54 }
 0x131   :  { %v3395_v49 = vpop.eup %3394  ;;  %v1076_v0 = vadd.f32 1.0, %v3393_v40  ;;  %3410 = vpow2.f32 %v2848_v26  ;;  %1862 = vmatprep.subr.bf16.mxu1 %v4821_v38  ;;  %v1196_v33 = vpack.c.bf16 %v1170_v14, %v1169_v41 }
 0x132   :  { %v261_v31 = vpop.permute.xlu1 %260  ;;  %v1075_v8 = vadd.f32 1.0, %v3395_v49  ;;  %3412 = vtanh.f32 %v852_v5  ;;  %v256_v58 = vpop.permute.xlu0 %255  ;;  %v1195_v15 = vpack.c.bf16 %v1168_v50, %v1167_v22 }
 0x133   :  { %v828_v4 = vadd.f32 %v4148_v6, %v261_v31  ;;  %v3137_v56 = vpop.f32.mrb[44].mxu0  ;;  %3414 = vrcp.f32 %v1076_v0  ;;  %v825_v63 = vadd.f32 %v4144_v2, %v256_v58 }
 0x134   :  { %v969_v52 = vadd.f32 %v3137_v56, %v3984_v17  ;;  %v960_v48 = vpop.f32.mrb[45].mxu0  ;;  %v3397_v44 = vpop.eup %3396  ;;  %3416 = vrcp.f32 %v1075_v8  ;;  %1863 = vmatpush1.bf16.msra.mxu1 %v1195_v15 }
 0x135   :  { %v2851_v7 = vmul.f32 -1.442695, %v828_v4  ;;  %v961_v36 = vadd.f32 %v960_v48, %v3974_v13  ;;  %v3138_v59 = vpop.f32.mrb[46].mxu0  ;;  %v3399_v19 = vpop.eup %3398  ;;  %3418 = vtanh.f32 %v849_v60  ;;  %v2850_v47 = vmul.f32 -1.442695, %v825_v63  ;;  %1864 = vmatprep.subr.bf16.mxu1 %v4821_v38 }
 0x136   :  { %v963_v6 = vpop.f32.mrb[47].mxu0  ;;  %v301_v32 = vpop.permute.xlu1 %300  ;;  %v1078_v11 = vadd.f32 1.0, %v3397_v44  ;;  %v972_v2 = vadd.f32 %v3138_v59, %v3982_v16  ;;  %v1173_v55 = vmax.f32 %v969_v52, 0.0 }
 0x137   :  { %v3401_v28 = vpop.eup %3400  ;;  %3420 = vpow2.f32 %v2851_v7  ;;  %v964_v17 = vadd.f32 %v963_v6, %v3972_v12  ;;  %v296_v51 = vpop.permute.xlu0 %295  ;;  %v1171_v13 = vmax.f32 %v961_v36, 0.0  ;;  %v860_v62 = vadd.f32 %v4180_v10, %v301_v32  ;;  %v4822_v6 = vld [vmem:[#allocation36_spill] sm:$0xff] }
 0x138   :  { %v3403_v42 = vpop.eup %3402  ;;  %v857_v23 = vadd.f32 %v4176_v27, %v296_v51  ;;  %3422 = vpow2.f32 %v2850_v47  ;;  %v1174_v18 = vmax.f32 %v972_v2, 0.0  ;;  %1865 = vmatpush1.bf16.msra.mxu1 %v1196_v33 }
 0x139   :  { %v3405_v30 = vpop.eup %3404  ;;  %v1077_v43 = vadd.f32 1.0, %v3403_v42  ;;  %v1172_v26 = vmax.f32 %v964_v17, 0.0  ;;  %3424 = vtanh.f32 %v860_v62  ;;  %1866 = vmatprep.subr.bf16.mxu1 %v4821_v38  ;;  %v4824_v42 = vld [vmem:[#allocation8_spill] sm:$0xff] }
 0x13a   :  { %v4269_v61 = vpop.eup %3406  ;;  %v1080_v16 = vadd.f32 1.0, %v3405_v30  ;;  %v271_v12 = vpop.permute.xlu1 %270  ;;  %3426 = vrcp.f32 %v1078_v11  ;;  %v1198_v34 = vpack.c.bf16 %v1174_v18, %v1173_v55  ;;  %v4825_v30 = vld [vmem:[#allocation6_spill] sm:$0xff] }
 0x13b   :  { %v4271_v39 = vpop.eup %3408  ;;  %v1197_v3 = vpack.c.bf16 %v1172_v26, %v1171_v13  ;;  %v836_v10 = vadd.f32 %v4166_v57, %v271_v12  ;;  %v266_v54 = vpop.permute.xlu0 %265  ;;  %3428 = vrcp.f32 %v1077_v43 }
 0x13c   :  { %v3141_v27 = vpop.f32.mrb[48].mxu0  ;;  %v3411_v9 = vpop.eup %3410  ;;  %v833_v5 = vadd.f32 %v4162_v37, %v266_v54  ;;  %3430 = vtanh.f32 %v857_v23 }
 0x13d   :  { %v985_v40 = vadd.f32 %v3141_v27, %v4004_v25  ;;  %v976_v41 = vpop.f32.mrb[49].mxu0  ;;  %v3413_v22 = vpop.eup %3412  ;;  %v1079_v14 = vadd.f32 1.0, %v3411_v9  ;;  %v2853_v49 = vmul.f32 -1.442695, %v836_v10  ;;  %3432 = vrcp.f32 %v1080_v16  ;;  %1867 = vmatpush1.bf16.msra.mxu1 %v1197_v3  ;;  %v4826_v16 = vld [vmem:[#allocation7_spill] sm:$0xff]  ;;  %v4827_v9 = vld [vmem:[#allocation5_spill] sm:$0xff] }
 0x13e   :  { %v977_v0 = vadd.f32 %v976_v41, %v3994_v21  ;;  %v3142_v50 = vpop.f32.mrb[50].mxu0  ;;  %v4278_v60 = vpop.eup %3414  ;;  %v1128_v57 = vmul.f32 %v3413_v22, %v3399_v19  ;;  %v2852_v31 = vmul.f32 -1.442695, %v833_v5  ;;  %1868 = vmatprep.subr.bf16.mxu1 %v4821_v38 }
 0x13f   :  { %v988_v8 = vadd.f32 %v3142_v50, %v4002_v24  ;;  %v979_v33 = vpop.f32.mrb[51].mxu0  ;;  %v311_v37 = vpop.permute.xlu1 %310  ;;  %3434 = vrcp.f32 %v1079_v14  ;;  %v1177_v56 = vmax.f32 %v985_v40, 0.0  ;;  %v4828_v14 = vld [vmem:[#allocation46_spill] sm:$0xff] }
 0x140   :  { %v4281_v4 = vpop.eup %3416  ;;  %v980_v25 = vadd.f32 %v979_v33, %v3992_v20  ;;  %v306_v58 = vpop.permute.xlu0 %305  ;;  %3436 = vtanh.f32 %v1128_v57  ;;  %v1175_v15 = vmax.f32 %v977_v0, 0.0  ;;  %v868_v44 = vadd.f32 %v4198_v1, %v311_v37  ;;  %v4823_v1 = vld [vmem:[#allocation35_spill] sm:$0xff] }
 0x141   :  { %v3419_v21 = vpop.eup %3418  ;;  %v1178_v63 = vmax.f32 %v988_v8, 0.0  ;;  %3438 = vpow2.f32 %v2853_v49  ;;  %1869 = vmatpush1.bf16.msra.mxu1 %v1198_v34  ;;  %v865_v47 = vadd.f32 %v4194_v53, %v306_v58 }
 0x142   :  { %v3421_v52 = vpop.eup %3420  ;;  %v1127_v48 = vmul.f32 %v3419_v21, %v3401_v28  ;;  %v1176_v24 = vmax.f32 %v980_v25, 0.0  ;;  %3440 = vpow2.f32 %v2852_v31  ;;  %v3145_v2 = vpop.f32.mrb[52].mxu0  ;;  %1870 = vmatprep.subr.bf16.mxu1 %v4821_v38  ;;  %v4829_v31 = vld [vmem:[#allocation45_spill] sm:$0xff] }
 0x143   :  { %v1082_v7 = vadd.f32 1.0, %v3421_v52  ;;  %v1200_v36 = vpack.c.bf16 %v1178_v63, %v1177_v56  ;;  %v281_v59 = vpop.permute.xlu1 %280  ;;  %v3423_v20 = vpop.eup %3422  ;;  %v1001_v55 = vadd.f32 %v3145_v2, %v4824_v42  ;;  %v4833_v2 = vld [vmem:[#allocation9_spill] sm:$0xff] }
 0x144   :  { %3442 = vtanh.f32 %v1127_v48  ;;  %v1199_v19 = vpack.c.bf16 %v1176_v24, %v1175_v15  ;;  %v844_v32 = vadd.f32 %v4822_v6, %v281_v59  ;;  %v276_v11 = vpop.permute.xlu0 %275  ;;  %v3425_v28 = vpop.eup %3424  ;;  %v1081_v17 = vadd.f32 1.0, %v3423_v20  ;;  %v4830_v15 = vld [vmem:[#allocation12_spill] sm:$0xff]  ;;  %v4832_v20 = vld [vmem:[#allocation11_spill] sm:$0xff] }
 0x145   :  { %3444 = vrcp.f32 %v1082_v7  ;;  %v841_v51 = vadd.f32 %v4823_v1, %v276_v11  ;;  %v992_v13 = vpop.f32.mrb[53].mxu0  ;;  %v4291_v62 = vpop.eup %3426  ;;  %v1130_v23 = vmul.f32 %v3425_v28, %v4269_v61  ;;  %v1181_v27 = vmax.f32 %v1001_v55, 0.0 }
 0x146   :  { %3446 = vtanh.f32 %v868_v44  ;;  %v2855_v53 = vmul.f32 -1.442695, %v844_v32  ;;  %v993_v43 = vadd.f32 %v992_v13, %v4825_v30  ;;  %v3146_v18 = vpop.f32.mrb[54].mxu0  ;;  %v4295_v26 = vpop.eup %3428  ;;  %1871 = vmatpush1.bf16.msra.mxu1 %v1199_v19  ;;  %v4831_v44 = vld [vmem:[#allocation10_spill] sm:$0xff] }
 0x147   :  { %3448 = vrcp.f32 %v1081_v17  ;;  %v1004_v12 = vadd.f32 %v3146_v18, %v4826_v16  ;;  %v995_v34 = vpop.f32.mrb[55].mxu0  ;;  %v321_v3 = vpop.permute.xlu1 %320  ;;  %v2854_v54 = vmul.f32 -1.442695, %v841_v51  ;;  %1872 = vmatprep.subr.bf16.mxu1 %v4821_v38  ;;  %v3280_v30 = vld [vmem:[%s4765_s2] ss:$12 sps:$4 sm:$0xff]  }
 0x148   :  { %v3431_v10 = vpop.eup %3430  ;;  %3450 = vtanh.f32 %v1130_v23  ;;  %v996_v5 = vadd.f32 %v995_v34, %v4827_v9  ;;  %v316_v61 = vpop.permute.xlu0 %315  ;;  %v876_v49 = vadd.f32 %v4828_v14, %v321_v3  ;;  %v1179_v50 = vmax.f32 %v993_v43, 0.0  ;;  %v3287_v14 = vld [vmem:[%s4765_s2 + $0x20] ss:$12 sps:$4 sm:$0xff]  }
 0x149   :  { %v3433_v40 = vpop.eup %3432  ;;  %v1129_v41 = vmul.f32 %v3431_v10, %v4271_v39  ;;  %3452 = vtanh.f32 %v865_v47  ;;  %v1182_v22 = vmax.f32 %v1004_v12, 0.0  ;;  %v873_v8 = vadd.f32 %v4829_v31, %v316_v61 }
 0x14a   :  { %v3435_v0 = vpop.eup %3434  ;;  %3454 = vpow2.f32 %v2855_v53  ;;  %v1180_v57 = vmax.f32 %v996_v5, 0.0  ;;  %1873 = vmatpush1.bf16.msra.mxu1 %v1200_v36  ;;  %v3149_v21 = vpop.f32.mrb[56].mxu0 }
 0x14b   :  { %v3437_v33 = vpop.eup %3436  ;;  %3456 = vtanh.f32 %v1129_v41  ;;  %v1202_v37 = vpack.c.bf16 %v1182_v22, %v1181_v27  ;;  %1874 = vmatprep.subr.bf16.mxu1 %v4821_v38  ;;  %v1017_v63 = vadd.f32 %v3149_v21, %v4830_v15  ;;  %v1008_v52 = vpop.f32.mrb[57].mxu0  ;;  %v3285_v22 = vld [vmem:[%s4765_s2 + $0x18] ss:$12 sps:$4 sm:$0xff]  }
 0x14c   :  { %v3439_v25 = vpop.eup %3438  ;;  %3458 = vpow2.f32 %v2854_v54  ;;  %v1201_v58 = vpack.c.bf16 %v1180_v57, %v1179_v50  ;;  %v4304_v39 = vmul.f32 %v3437_v33, %v3433_v40  ;;  %v1009_v7 = vadd.f32 %v1008_v52, %v4831_v44  ;;  %v3150_v59 = vpop.f32.mrb[58].mxu0  ;;  %v3293_v21 = vld [vmem:[%s4765_s2 + $0x4c] ss:$12 sps:$4 sm:$0xff]  }
 0x14d   :  { %v3441_v56 = vpop.eup %3440  ;;  %3460 = vtanh.f32 %v876_v49  ;;  %v1084_v24 = vadd.f32 1.0, %v3439_v25  ;;  %v1020_v19 = vadd.f32 %v3150_v59, %v4832_v20  ;;  %v1011_v47 = vpop.f32.mrb[59].mxu0  ;;  %v1185_v51 = vmax.f32 %v1017_v63, 0.0  ;;  %v3291_v49 = vld [vmem:[%s4765_s2 + $0x38] ss:$12 sps:$4 sm:$0xff]  }
 0x14e   :  { %v3443_v48 = vpop.eup %3442  ;;  %3462 = vtanh.f32 %v873_v8  ;;  %1875 = vmatpush1.bf16.msra.mxu1 %v1201_v58  ;;  %v1083_v11 = vadd.f32 1.0, %v3441_v56  ;;  %v1012_v28 = vadd.f32 %v1011_v47, %v4833_v2  ;;  %v1183_v23 = vmax.f32 %v1009_v7, 0.0  ;;  %v3292_v25 = vld [vmem:[%s4765_s2 + $0x50] ss:$12 sps:$4 sm:$0xff]   ;;  %v3299_v56 = vld [vmem:[%s4765_s2 + $0x68] ss:$12 sps:$4 sm:$0xff]  }
 0x14f   :  { %v3445_v36 = vpop.eup %3444  ;;  %v4309_v6 = vmul.f32 %v3443_v48, %v3435_v0  ;;  %1876 = vmatprep.subr.bf16.mxu1 %v4821_v38  ;;  %v1186_v42 = vmax.f32 %v1020_v19, 0.0  ;;  %3464 = vrcp.f32 %v1084_v24  ;;  %v3283_v38 = vld [vmem:[%s4765_s2 + $0x1c] ss:$12 sps:$4 sm:$0xff]   ;;  %v3300_v59 = vld [vmem:[%s4765_s2 + $0x80] ss:$12 sps:$4 sm:$0xff]  }
 0x150   :  { %v3447_v32 = vpop.eup %3446  ;;  %v1184_v53 = vmax.f32 %v1012_v28, 0.0  ;;  %v3295_v7 = vld [vmem:[%s4765_s2 + $0x48] ss:$12 sps:$4 sm:$0xff]   ;;  %v3307_v20 = vld [vmem:[%s4765_s2 + $0x98] ss:$12 sps:$4 sm:$0xff]  }
 0x151   :  { %v3449_v17 = vpop.eup %3448  ;;  %v1132_v1 = vmul.f32 %v3447_v32, %v4278_v60  ;;  %v2666_v55 = vpack.c.bf16 %v4304_v39, %v4309_v6  ;;  %v1204_v18 = vpack.c.bf16 %v1186_v42, %v1185_v51  ;;  %v3298_v19 = vld [vmem:[%s4765_s2 + $0x60] ss:$12 sps:$4 sm:$0xff]   ;;  %v3308_v47 = vld [vmem:[%s4765_s2 + $0xb0] ss:$12 sps:$4 sm:$0xff]   ;;  %v3303_v2 = vld [vmem:[%s4765_s2 + $0x78] ss:$12 sps:$4 sm:$0xff]  }
 0x152   :  { %v3451_v13 = vpop.eup %3450  ;;  %1877 = vmatpush1.bf16.msra.mxu1 %v1202_v37  ;;  %v1203_v34 = vpack.c.bf16 %v1184_v53, %v1183_v23  ;;  %v3290_v37 = vld [vmem:[%s4765_s2 + $0x30] ss:$12 sps:$4 sm:$0xff]   ;;  %v3316_v28 = vld [vmem:[%s4765_s2 + $0xe0] ss:$12 sps:$4 sm:$0xff]   ;;  %v3331_v23 = vld [vmem:[%s4765_s2 + $0x128] ss:$12 sps:$4 sm:$0xff]  }
 0x153   :  { %v3453_v43 = vpop.eup %3452  ;;  %3466 = vtanh.f32 %v1132_v1  ;;  %v4322_v60 = vmul.f32 %v3451_v13, %v3445_v36  ;;  %v3296_v36 = vld [vmem:[%s4765_s2 + $0x64] ss:$12 sps:$4 sm:$0xff]   ;;  %v3301_v32 = vld [vmem:[%s4765_s2 + $0x7c] ss:$12 sps:$4 sm:$0xff]   ;;  %v3309_v13 = vld [vmem:[%s4765_s2 + $0xac] ss:$12 sps:$4 sm:$0xff]  }
 0x154   :  { %v3455_v16 = vpop.eup %3454  ;;  %v1131_v12 = vmul.f32 %v3453_v43, %v4281_v4  ;;  %3468 = vrcp.f32 %v1083_v11  ;;  %3151 = vmatprep.subr.bf16.mxu0 %v1203_v34  ;;  %v3315_v11 = vld [vmem:[%s4765_s2 + $0xc8] ss:$12 sps:$4 sm:$0xff]   ;;  %v3323_v1 = vld [vmem:[%s4765_s2 + $0xf8] ss:$12 sps:$4 sm:$0xff]   ;;  %v3306_v51 = vld [vmem:[%s4765_s2 + $0x90] ss:$12 sps:$4 sm:$0xff]  }
 0x155   :  { %v3457_v3 = vpop.eup %3456  ;;  %v1086_v10 = vadd.f32 1.0, %v3455_v16  ;;  %1879 = vmatmul.mubr.bf16.vlgmr.msra.gmra.mrb[0].mxu1 %v3280_v30  ;;  %3152 = vmatpush3.bf16.msra.mxu0 %v1203_v34  ;;  %v3324_v42 = vld [vmem:[%s4765_s2 + $0x110] ss:$12 sps:$4 sm:$0xff]   ;;  %v3311_v53 = vld [vmem:[%s4765_s2 + $0xa8] ss:$12 sps:$4 sm:$0xff]  }
 0x156   :  { %v3459_v54 = vpop.eup %3458  ;;  %3470 = vtanh.f32 %v1131_v12  ;;  %v4325_v27 = vmul.f32 %v3457_v3, %v3449_v17  ;;  %1886 = vmatprep.mubr.bf16.mxu1 %v3283_v38  ;;  %3153 = vmatprep.subr.bf16.mxu0 %v1204_v18  ;;  %v3304_v17 = vld [vmem:[%s4765_s2 + $0x94] ss:$12 sps:$4 sm:$0xff]   ;;  %v3312_v43 = vld [vmem:[%s4765_s2 + $0xc4] ss:$12 sps:$4 sm:$0xff]   ;;  %v3317_v12 = vld [vmem:[%s4765_s2 + $0xdc] ss:$12 sps:$4 sm:$0xff]  }
 0x157   :  { %v3461_v9 = vpop.eup %3460  ;;  %v1085_v5 = vadd.f32 1.0, %v3459_v54  ;;  %3472 = vrcp.f32 %v1086_v10  ;;  %v3332_v30 = vld [vmem:[%s4765_s2 + $0x140] ss:$12 sps:$4 sm:$0xff]   ;;  %v3340_v16 = vld [vmem:[%s4765_s2 + $0x170] ss:$12 sps:$4 sm:$0xff]  }
 0x158   :  { %v3463_v61 = vpop.eup %3462  ;;  %v1134_v40 = vmul.f32 %v3461_v9, %v4291_v62  ;;  %v2667_v4 = vpack.c.bf16 %v4322_v60, %v4325_v27  ;;  %v3288_v62 = vld [vmem:[%s4765_s2 + $0x34] ss:$12 sps:$4 sm:$0xff]   ;;  %v3319_v3 = vld [vmem:[%s4765_s2 + $0xd8] ss:$12 sps:$4 sm:$0xff]  }
 0x159   :  { %3474 = vrcp.f32 %v1085_v5  ;;  %v1133_v41 = vmul.f32 %v3463_v61, %v4295_v26  ;;  %3154 = vmatpush3.bf16.msra.mxu0 %v1204_v18  ;;  %v3465_v26 = vpop.eup %3464  ;;  %v3339_v18 = vld [vmem:[%s4765_s2 + $0x158] ss:$12 sps:$4 sm:$0xff]   ;;  %v3314_v38 = vld [vmem:[%s4765_s2 + $0xc0] ss:$12 sps:$4 sm:$0xff]   ;;  %v3344_v34 = vld [vmem:[%s4765_s2 + $0x188] ss:$12 sps:$4 sm:$0xff]  }
 0x15a   :  { %3476 = vtanh.f32 %v1134_v40  ;;  %v3345_v10 = vld [vmem:[%s4765_s2 + $0x1a0] ss:$12 sps:$4 sm:$0xff]   ;;  %v3355_v9 = vld [vmem:[%s4765_s2 + $0x1b8] ss:$12 sps:$4 sm:$0xff]   ;;  %v3322_v5 = vld [vmem:[%s4765_s2 + $0xf0] ss:$12 sps:$4 sm:$0xff]  }
 0x15b   :  { %3478 = vtanh.f32 %v1133_v41  ;;  %v3320_v54 = vld [vmem:[%s4765_s2 + $0xf4] ss:$12 sps:$4 sm:$0xff]   ;;  %v3356_v61 = vld [vmem:[%s4765_s2 + $0x1d0] ss:$12 sps:$4 sm:$0xff]   ;;  %v3325_v40 = vld [vmem:[%s4765_s2 + $0x10c] ss:$12 sps:$4 sm:$0xff]  }
 0x15c   :  { %3156 = vmatmul.mubr.msk.bf16.vlgmr.msra.gmra.mrb[60].mxu0 %vm1785_vm1, %v3287_v14  ;;  %v3327_v41 = vld [vmem:[%s4765_s2 + $0x108] ss:$12 sps:$4 sm:$0xff]   ;;  %v3330_v14 = vld [vmem:[%s4765_s2 + $0x120] ss:$12 sps:$4 sm:$0xff]  }
 0x15d   :  { %v3467_v0 = vpop.eup %3466  ;;  %1887 = vmatmul.mubr.bf16.gmra.mrb[4].mxu1 %v3285_v22  ;;  %3159 = vmatprep.mubr.msk.bf16.mxu0 %vm1785_vm1, %v3291_v49  ;;  %v3328_v22 = vld [vmem:[%s4765_s2 + $0x124] ss:$12 sps:$4 sm:$0xff]  }
 0x15e   :  { %v4344_v50 = vmul.f32 %v3467_v0, %v3465_v26  ;;  %v3469_v57 = vpop.eup %3468  ;;  %1894 = vmatprep.mubr.bf16.mxu1 %v3288_v62  ;;  %v3333_v62 = vld [vmem:[%s4765_s2 + $0x13c] ss:$12 sps:$4 sm:$0xff]   ;;  %v3335_v49 = vld [vmem:[%s4765_s2 + $0x138] ss:$12 sps:$4 sm:$0xff]   ;;  %v3336_v26 = vld [vmem:[%s4765_s2 + $0x154] ss:$12 sps:$4 sm:$0xff]  }
 0x15f   :  { %v3338_v0 = vld [vmem:[%s4765_s2 + $0x150] ss:$12 sps:$4 sm:$0xff]  }
 0x160   :  { %v3471_v31 = vpop.eup %3470 }
 0x161   :  { %v4347_v8 = vmul.f32 %v3471_v31, %v3469_v57  ;;  %v3473_v33 = vpop.eup %3472  ;;  %v3341_v57 = vld [vmem:[%s4765_s2 + $0x16c] ss:$12 sps:$4 sm:$0xff]   ;;  %v3343_v31 = vld [vmem:[%s4765_s2 + $0x168] ss:$12 sps:$4 sm:$0xff]  }
 0x163   :  { %v3475_v58 = vpop.eup %3474  ;;  %v2668_v15 = vpack.c.bf16 %v4344_v50, %v4347_v8 }
 0x164   :  { %v3477_v63 = vpop.eup %3476  ;;  %3160 = vmatmul.mubr.msk.bf16.gmra.mrb[64].mxu0 %vm1785_vm1, %v3292_v25  ;;  %v3349_v25 = vld [vmem:[%s4765_s2 + $0x19c] ss:$12 sps:$4 sm:$0xff]  }
 0x165   :  { %v3479_v52 = vpop.eup %3478  ;;  %v4363_v48 = vmul.f32 %v3477_v63, %v3473_v33  ;;  %1895 = vmatmul.mubr.bf16.gmra.mrb[8].mxu1 %v3290_v37  ;;  %3163 = vmatprep.mubr.msk.bf16.mxu0 %vm1785_vm1, %v3299_v56  ;;  %v3346_v33 = vld [vmem:[%s4765_s2 + $0x184] ss:$12 sps:$4 sm:$0xff]   ;;  %v3348_v37 = vld [vmem:[%s4765_s2 + $0x180] ss:$12 sps:$4 sm:$0xff]  }
 0x166   :  { %v4366_v24 = vmul.f32 %v3479_v52, %v3475_v58  ;;  %1902 = vmatprep.mubr.bf16.mxu1 %v3293_v21  ;;  %v3351_v58 = vld [vmem:[%s4765_s2 + $0x198] ss:$12 sps:$4 sm:$0xff]   ;;  %v3352_v21 = vld [vmem:[%s4765_s2 + $0x1b4] ss:$12 sps:$4 sm:$0xff]   ;;  %v3354_v56 = vld [vmem:[%s4765_s2 + $0x1b0] ss:$12 sps:$4 sm:$0xff]  }
 0x167   :  { %v3357_v63 = vld [vmem:[%s4765_s2 + $0x1cc] ss:$12 sps:$4 sm:$0xff]   ;;  %v3359_v52 = vld [vmem:[%s4765_s2 + $0x1c8] ss:$12 sps:$4 sm:$0xff]  }
 0x168   :  { %v2669_v44 = vpack.c.bf16 %v4363_v48, %v4366_v24  ;;  %v4869_v48 = vld [vmem:[#allocation52_spill] sm:$0xff] }
 0x16c   :  { %3164 = vmatmul.mubr.msk.bf16.gmra.mrb[68].mxu0 %vm1785_vm1, %v3300_v59 }
 0x16d   :  { %1903 = vmatmul.mubr.bf16.gmra.mrb[12].mxu1 %v3295_v7  ;;  %3167 = vmatprep.mubr.msk.bf16.mxu0 %vm1785_vm1, %v3307_v20 }
 0x16e   :  { %1910 = vmatprep.mubr.bf16.mxu1 %v3296_v36 }
 0x174   :  { %3168 = vmatmul.mubr.msk.bf16.gmra.mrb[72].mxu0 %vm1785_vm1, %v3308_v47  ;;  %v4834_v47 = vld [vmem:[#allocation16_spill] sm:$0xff] }
 0x175   :  { %1911 = vmatmul.mubr.bf16.gmra.mrb[16].mxu1 %v3298_v19  ;;  %3171 = vmatprep.mubr.msk.bf16.mxu0 %vm1785_vm1, %v3315_v11  ;;  %v3362_v19 = vld [vmem:[%s4766_s3 + $0x4] ss:$12 sps:$4 sm:$0xff]  }
 0x176   :  { %1918 = vmatprep.mubr.bf16.mxu1 %v3301_v32 }
 0x17c   :  { %3172 = vmatmul.mubr.msk.bf16.gmra.mrb[76].mxu0 %vm1785_vm1, %v3316_v28  ;;  %v4835_v28 = vld [vmem:[#allocation20_spill] sm:$0xff] }
 0x17d   :  { %1919 = vmatmul.mubr.bf16.gmra.mrb[20].mxu1 %v3303_v2  ;;  %3175 = vmatprep.mubr.msk.bf16.mxu0 %vm1785_vm1, %v3323_v1 }
 0x17e   :  { %1926 = vmatprep.mubr.bf16.mxu1 %v3304_v17 }
 0x184   :  { %3176 = vmatmul.mubr.msk.bf16.gmra.mrb[80].mxu0 %vm1785_vm1, %v3324_v42  ;;  %v4836_v42 = vld [vmem:[#allocation15_spill] sm:$0xff] }
 0x185   :  { %1927 = vmatmul.mubr.bf16.gmra.mrb[24].mxu1 %v3306_v51  ;;  %3179 = vmatprep.mubr.msk.bf16.mxu0 %vm1785_vm1, %v3331_v23 }
 0x186   :  { %1934 = vmatprep.mubr.bf16.mxu1 %v3309_v13 }
 0x18c   :  { %3180 = vmatmul.mubr.msk.bf16.gmra.mrb[84].mxu0 %vm1785_vm1, %v3332_v30 }
 0x18d   :  { %1935 = vmatmul.mubr.bf16.gmra.mrb[28].mxu1 %v3311_v53  ;;  %3183 = vmatprep.mubr.msk.bf16.mxu0 %vm1785_vm1, %v3339_v18  ;;  %v4837_v18 = vld [vmem:[#allocation19_spill] sm:$0xff] }
 0x18e   :  { %1942 = vmatprep.mubr.bf16.mxu1 %v3312_v43 }
 0x194   :  { %3184 = vmatmul.mubr.msk.bf16.gmra.mrb[88].mxu0 %vm1785_vm1, %v3340_v16 }
 0x195   :  { %1943 = vmatmul.mubr.bf16.gmra.mrb[32].mxu1 %v3314_v38  ;;  %3187 = vmatprep.mubr.msk.bf16.mxu0 %vm1785_vm1, %v3344_v34 }
 0x196   :  { %1950 = vmatprep.mubr.bf16.mxu1 %v3317_v12 }
 0x19c   :  { %3188 = vmatmul.mubr.msk.bf16.gmra.mrb[92].mxu0 %vm1785_vm1, %v3345_v10 }
 0x19d   :  { %1951 = vmatmul.mubr.bf16.gmra.mrb[36].mxu1 %v3319_v3  ;;  %3191 = vmatprep.mubr.msk.bf16.mxu0 %vm1785_vm1, %v3355_v9 }
 0x19e   :  { %1958 = vmatprep.mubr.bf16.mxu1 %v3320_v54 }
 0x1a4   :  { %3192 = vmatmul.mubr.msk.bf16.gmra.mrb[96].mxu0 %vm1785_vm1, %v3356_v61 }
 0x1a5   :  { %1959 = vmatmul.mubr.bf16.gmra.mrb[40].mxu1 %v3322_v5  ;;  %2517 = vmatprep.mubr.bf16.mxu0 %v3362_v19 }
 0x1a6   :  { %1966 = vmatprep.mubr.bf16.mxu1 %v3325_v40 }
 0x1ad   :  { %1967 = vmatmul.mubr.bf16.gmra.mrb[44].mxu1 %v3327_v41 }
 0x1ae   :  { %1974 = vmatprep.mubr.bf16.mxu1 %v3328_v22 }
 0x1b5   :  { %1975 = vmatmul.mubr.bf16.gmra.mrb[48].mxu1 %v3330_v14  ;;  %v4838_v14 = vld [vmem:[#allocation24_spill] sm:$0xff] }
 0x1b6   :  { %1982 = vmatprep.mubr.bf16.mxu1 %v3333_v62 }
 0x1bd   :  { %1983 = vmatmul.mubr.bf16.gmra.mrb[52].mxu1 %v3335_v49 }
 0x1be   :  { %1990 = vmatprep.mubr.bf16.mxu1 %v3336_v26 }
 0x1c5   :  { %1991 = vmatmul.mubr.bf16.gmra.mrb[56].mxu1 %v3338_v0 }
 0x1c6   :  { %1998 = vmatprep.mubr.bf16.mxu1 %v3341_v57 }
 0x1cd   :  { %1999 = vmatmul.mubr.bf16.gmra.mrb[60].mxu1 %v3343_v31  ;;  %v4839_v31 = vld [vmem:[#allocation23_spill] sm:$0xff] }
 0x1ce   :  { %2006 = vmatprep.mubr.bf16.mxu1 %v3346_v33 }
 0x1d5   :  { %2007 = vmatmul.mubr.bf16.gmra.mrb[64].mxu1 %v3348_v37 }
 0x1d6   :  { %2014 = vmatprep.mubr.bf16.mxu1 %v3349_v25 }
 0x1dd   :  { %2015 = vmatmul.mubr.bf16.gmra.mrb[68].mxu1 %v3351_v58 }
 0x1de   :  { %2022 = vmatprep.mubr.bf16.mxu1 %v3352_v21 }
 0x1e5   :  { %2023 = vmatmul.mubr.bf16.gmra.mrb[72].mxu1 %v3354_v56 }
 0x1e6   :  { %2030 = vmatprep.mubr.bf16.mxu1 %v3357_v63 }
 0x1ed   :  { %2031 = vmatmul.mubr.bf16.gmra.mrb[76].mxu1 %v3359_v52 }
 0x228   :  { %v1880_v7 = vpop.f32.mrb[0].mxu1 }
 0x229   :  { %v1882_v59 = vpop.f32.mrb[1].mxu1  ;;  %v1881_v32 = vadd.f32 %v1880_v7, %v4834_v47 }
 0x22a   :  { %v1883_v36 = vpop.f32.mrb[2].mxu1 }
 0x22b   :  { %v1885_v20 = vpop.f32.mrb[3].mxu1  ;;  %v1884_v13 = vadd.f32 %v1883_v36, %v4836_v42  ;;  %v4840_v36 = vld [vmem:[#allocation28_spill] sm:$0xff] }
 0x22f   :  { %v3157_v2 = vpop.f32.mrb[60].mxu0 }
 0x230   :  { %v1888_v11 = vpop.f32.mrb[4].mxu1  ;;  %v2073_v51 = vpop.f32.mrb[61].mxu0 }
 0x231   :  { %v1889_v17 = vadd.f32 %v1888_v11, %v4835_v28  ;;  %v1890_v1 = vpop.f32.mrb[5].mxu1  ;;  %v2074_v53 = vadd.f32 %v2073_v51, %v1881_v32  ;;  %v3158_v30 = vpop.f32.mrb[62].mxu0  ;;  %v4841_v28 = vld [vmem:[#allocation27_spill] sm:$0xff] }
 0x232   :  { %v1891_v23 = vpop.f32.mrb[6].mxu1  ;;  %v2076_v12 = vpop.f32.mrb[63].mxu0 }
 0x233   :  { %v2082_v43 = vadd.f32 %v3157_v2, %v1889_v17  ;;  %v1892_v38 = vadd.f32 %v1891_v23, %v4837_v18  ;;  %v1893_v16 = vpop.f32.mrb[7].mxu1  ;;  %v2077_v34 = vadd.f32 %v2076_v12, %v1884_v13  ;;  %v2232_v10 = vmax.f32 %v2074_v53, 0.0  ;;  %v4842_v18 = vld [vmem:[#allocation32_spill] sm:$0xff] }
 0x235   :  { %v2085_v3 = vadd.f32 %v3158_v30, %v1892_v38  ;;  %v2233_v54 = vmax.f32 %v2077_v34, 0.0  ;;  %v2234_v9 = vmax.f32 %v2082_v43, 0.0 }
 0x237   :  { %v2235_v5 = vmax.f32 %v2085_v3, 0.0  ;;  %v4537_v61 = vpack.c.bf16 %v2233_v54, %v2232_v10  ;;  %v3161_v41 = vpop.f32.mrb[64].mxu0  ;;  %v4843_v10 = vld [vmem:[#allocation31_spill] sm:$0xff] }
 0x238   :  { %v1896_v40 = vpop.f32.mrb[8].mxu1  ;;  %v2089_v26 = vpop.f32.mrb[65].mxu0 }
 0x239   :  { %v4539_v22 = vpack.c.bf16 %v2235_v5, %v2234_v9  ;;  %v1897_v62 = vadd.f32 %v1896_v40, %v4838_v14  ;;  %v1898_v49 = vpop.f32.mrb[9].mxu1  ;;  %v3162_v57 = vpop.f32.mrb[66].mxu0 }
 0x23a   :  { %v1899_v0 = vpop.f32.mrb[10].mxu1  ;;  %v2092_v58 = vpop.f32.mrb[67].mxu0 }
 0x23b   :  { %v1900_v33 = vadd.f32 %v1899_v0, %v4839_v31  ;;  %v2090_v37 = vadd.f32 %v2089_v26, %v1897_v62  ;;  %v1901_v25 = vpop.f32.mrb[11].mxu1  ;;  %v4844_v31 = vld [vmem:[#allocation38_spill] sm:$0xff] }
 0x23d   :  { %v2093_v21 = vadd.f32 %v2092_v58, %v1900_v33  ;;  %v2236_v56 = vmax.f32 %v2090_v37, 0.0 }
 0x23f   :  { %v2237_v63 = vmax.f32 %v2093_v21, 0.0  ;;  %v3165_v7 = vpop.f32.mrb[68].mxu0 }
 0x240   :  { %v1904_v52 = vpop.f32.mrb[12].mxu1  ;;  %v2105_v47 = vpop.f32.mrb[69].mxu0 }
 0x241   :  { %v4543_v59 = vpack.c.bf16 %v2237_v63, %v2236_v56  ;;  %v1905_v20 = vadd.f32 %v1904_v52, %v4840_v36  ;;  %v1906_v19 = vpop.f32.mrb[13].mxu1  ;;  %v3166_v11 = vpop.f32.mrb[70].mxu0  ;;  %v4845_v63 = vld [vmem:[#allocation37_spill] sm:$0xff] }
 0x242   :  { %v1907_v32 = vpop.f32.mrb[14].mxu1  ;;  %v2108_v51 = vpop.f32.mrb[71].mxu0 }
 0x243   :  { %v2098_v2 = vadd.f32 %v3161_v41, %v1905_v20  ;;  %v1908_v17 = vadd.f32 %v1907_v32, %v4841_v28  ;;  %v1909_v1 = vpop.f32.mrb[15].mxu1  ;;  %v3374_v41 = vld [vmem:[%s4766_s3 + $0x8] ss:$12 sps:$4 sm:$0xff]  }
 0x244   :  { %3203 = vmatprep.mubr.msk.bf16.mxu1 %vm2466_vm2, %v3374_v41  ;;  %v4846_v1 = vld [vmem:[#allocation42_spill] sm:$0xff] }
 0x245   :  { %v2101_v42 = vadd.f32 %v3162_v57, %v1908_v17  ;;  %v2238_v13 = vmax.f32 %v2098_v2, 0.0 }
 0x247   :  { %v2239_v23 = vmax.f32 %v2101_v42, 0.0  ;;  %v3169_v30 = vpop.f32.mrb[72].mxu0 }
 0x248   :  { %v1912_v53 = vpop.f32.mrb[16].mxu1  ;;  %v2121_v12 = vpop.f32.mrb[73].mxu0 }
 0x249   :  { %v4547_v43 = vpack.c.bf16 %v2239_v23, %v2238_v13  ;;  %v1913_v38 = vadd.f32 %v1912_v53, %v4842_v18  ;;  %v1914_v16 = vpop.f32.mrb[17].mxu1  ;;  %v3170_v3 = vpop.f32.mrb[74].mxu0 }
 0x24a   :  { %v1915_v34 = vpop.f32.mrb[18].mxu1  ;;  %v2124_v40 = vpop.f32.mrb[75].mxu0 }
 0x24b   :  { %v1916_v54 = vadd.f32 %v1915_v34, %v4843_v10  ;;  %v2106_v9 = vadd.f32 %v2105_v47, %v1913_v38  ;;  %v1917_v5 = vpop.f32.mrb[19].mxu1 }
 0x24d   :  { %v2109_v14 = vadd.f32 %v2108_v51, %v1916_v54  ;;  %v2240_v62 = vmax.f32 %v2106_v9, 0.0 }
 0x24f   :  { %v2241_v49 = vmax.f32 %v2109_v14, 0.0  ;;  %v4555_v0 = vpop.f32.mrb[76].mxu0  ;;  %v4848_v14 = vld [vmem:[#allocation48_spill] sm:$0xff] }
 0x250   :  { %v1920_v26 = vpop.f32.mrb[20].mxu1  ;;  %v2137_v25 = vpop.f32.mrb[77].mxu0 }
 0x251   :  { %v4557_v57 = vpack.c.bf16 %v2241_v49, %v2240_v62  ;;  %v1921_v33 = vadd.f32 %v1920_v26, %v4844_v31  ;;  %v1922_v37 = vpop.f32.mrb[21].mxu1  ;;  %v4560_v21 = vpop.f32.mrb[78].mxu0 }
 0x252   :  { %v1923_v58 = vpop.f32.mrb[22].mxu1  ;;  %v2140_v20 = vpop.f32.mrb[79].mxu0  ;;  %v4849_v37 = vld [vmem:[#allocation47_spill] sm:$0xff] }
 0x253   :  { %v2114_v56 = vadd.f32 %v3165_v7, %v1921_v33  ;;  %v1924_v52 = vadd.f32 %v1923_v58, %v4845_v63  ;;  %v1925_v36 = vpop.f32.mrb[23].mxu1  ;;  %v4847_v7 = vld [vmem:[#allocation41_spill] sm:$0xff] }
 0x255   :  { %v2117_v19 = vadd.f32 %v3166_v11, %v1924_v52  ;;  %v2242_v47 = vmax.f32 %v2114_v56, 0.0 }
 0x257   :  { %v2243_v32 = vmax.f32 %v2117_v19, 0.0  ;;  %v4563_v28 = vpop.f32.mrb[80].mxu0 }
 0x258   :  { %v1928_v2 = vpop.f32.mrb[24].mxu1  ;;  %v4568_v13 = vpop.f32.mrb[81].mxu0 }
 0x259   :  { %v4565_v17 = vpack.c.bf16 %v2243_v32, %v2242_v47  ;;  %v1929_v51 = vadd.f32 %v1928_v2, %v4846_v1  ;;  %v1930_v42 = vpop.f32.mrb[25].mxu1  ;;  %v4570_v53 = vpop.f32.mrb[82].mxu0  ;;  %v4850_v2 = vld [vmem:[#allocation14_spill] sm:$0xff] }
 0x25a   :  { %v1931_v23 = vpop.f32.mrb[26].mxu1  ;;  %v4573_v11 = vpop.f32.mrb[83].mxu0 }
 0x25b   :  { %v1932_v18 = vadd.f32 %v1931_v23, %v4847_v7  ;;  %v2122_v38 = vadd.f32 %v2121_v12, %v1929_v51  ;;  %v1933_v16 = vpop.f32.mrb[27].mxu1  ;;  %v4851_v7 = vld [vmem:[#allocation13_spill] sm:$0xff] }
 0x25d   :  { %v2125_v34 = vadd.f32 %v2124_v40, %v1932_v18  ;;  %v2244_v10 = vmax.f32 %v2122_v38, 0.0 }
 0x25f   :  { %v2245_v54 = vmax.f32 %v2125_v34, 0.0  ;;  %v4575_v5 = vpop.f32.mrb[84].mxu0 }
 0x260   :  { %v1936_v9 = vpop.f32.mrb[28].mxu1  ;;  %v4580_v26 = vpop.f32.mrb[85].mxu0 }
 0x261   :  { %v4577_v41 = vpack.c.bf16 %v2245_v54, %v2244_v10  ;;  %v1937_v62 = vadd.f32 %v1936_v9, %v4848_v14  ;;  %v1938_v49 = vpop.f32.mrb[29].mxu1  ;;  %v4582_v33 = vpop.f32.mrb[86].mxu0 }
 0x262   :  { %v1939_v31 = vpop.f32.mrb[30].mxu1  ;;  %v4585_v40 = vpop.f32.mrb[87].mxu0  ;;  %v4852_v49 = vld [vmem:[#allocation18_spill] sm:$0xff] }
 0x263   :  { %v2130_v12 = vadd.f32 %v3169_v30, %v1937_v62  ;;  %v1940_v58 = vadd.f32 %v1939_v31, %v4849_v37  ;;  %v1941_v56 = vpop.f32.mrb[31].mxu1 }
 0x265   :  { %v2133_v63 = vadd.f32 %v3170_v3, %v1940_v58  ;;  %v2246_v52 = vmax.f32 %v2130_v12, 0.0 }
 0x267   :  { %v2247_v36 = vmax.f32 %v2133_v63, 0.0  ;;  %v4587_v47 = vpop.f32.mrb[88].mxu0  ;;  %v4853_v63 = vld [vmem:[#allocation17_spill] sm:$0xff] }
 0x268   :  { %v1944_v19 = vpop.f32.mrb[32].mxu1  ;;  %v4592_v42 = vpop.f32.mrb[89].mxu0 }
 0x269   :  { %v4589_v32 = vpack.c.bf16 %v2247_v36, %v2246_v52  ;;  %v1945_v1 = vadd.f32 %v1944_v19, %v4850_v2  ;;  %v1946_v51 = vpop.f32.mrb[33].mxu1  ;;  %v4594_v30 = vpop.f32.mrb[90].mxu0 }
 0x26a   :  { %v1947_v23 = vpop.f32.mrb[34].mxu1  ;;  %v4597_v3 = vpop.f32.mrb[91].mxu0 }
 0x26b   :  { %v1948_v18 = vadd.f32 %v1947_v23, %v4851_v7  ;;  %v2138_v38 = vadd.f32 %v2137_v25, %v1945_v1  ;;  %v1949_v16 = vpop.f32.mrb[35].mxu1  ;;  %v4854_v7 = vld [vmem:[#allocation22_spill] sm:$0xff] }
 0x26d   :  { %v2141_v34 = vadd.f32 %v2140_v20, %v1948_v18  ;;  %v2248_v10 = vmax.f32 %v2138_v38, 0.0 }
 0x26f   :  { %v2249_v54 = vmax.f32 %v2141_v34, 0.0  ;;  %v4599_v14 = vpop.f32.mrb[92].mxu0 }
 0x270   :  { %v1952_v9 = vpop.f32.mrb[36].mxu1  ;;  %v4602_v37 = vpop.f32.mrb[93].mxu0 }
 0x271   :  { %v2280_v62 = vpack.c.bf16 %v2249_v54, %v2248_v10  ;;  %v1953_v31 = vadd.f32 %v1952_v9, %v4852_v49  ;;  %v1954_v12 = vpop.f32.mrb[37].mxu1  ;;  %v4604_v56 = vpop.f32.mrb[94].mxu0  ;;  %v4855_v54 = vld [vmem:[#allocation21_spill] sm:$0xff] }
 0x272   :  { %v1955_v58 = vpop.f32.mrb[38].mxu1  ;;  %v4608_v20 = vpop.f32.mrb[95].mxu0 }
 0x273   :  { %v2146_v25 = vadd.f32 %v4555_v0, %v1953_v31  ;;  %v1956_v52 = vadd.f32 %v1955_v58, %v4853_v63  ;;  %v1957_v36 = vpop.f32.mrb[39].mxu1  ;;  %3015 = vmatprep.subr.bf16.mxu0 %v2280_v62  ;;  %v4856_v63 = vld [vmem:[#allocation26_spill] sm:$0xff] }
 0x274   :  { %3016 = vmatpush3.bf16.msra.mxu0 %v4537_v61 }
 0x275   :  { %v2149_v19 = vadd.f32 %v4560_v21, %v1956_v52  ;;  %v2250_v2 = vmax.f32 %v2146_v25, 0.0 }
 0x277   :  { %v2251_v1 = vmax.f32 %v2149_v19, 0.0  ;;  %v4612_v23 = vpop.f32.mrb[96].mxu0 }
 0x278   :  { %v1960_v51 = vpop.f32.mrb[40].mxu1  ;;  %v4615_v0 = vpop.f32.mrb[97].mxu0 }
 0x279   :  { %v1961_v18 = vadd.f32 %v1960_v51, %v4854_v7  ;;  %v1962_v38 = vpop.f32.mrb[41].mxu1  ;;  %v2281_v16 = vpack.c.bf16 %v2251_v1, %v2250_v2  ;;  %v4617_v10 = vpop.f32.mrb[98].mxu0  ;;  %v4857_v1 = vld [vmem:[#allocation25_spill] sm:$0xff] }
 0x27a   :  { %v1963_v34 = vpop.f32.mrb[42].mxu1  ;;  %v4621_v21 = vpop.f32.mrb[99].mxu0  ;;  %v4858_v38 = vld [vmem:[#allocation30_spill] sm:$0xff] }
 0x27b   :  { %v1964_v9 = vadd.f32 %v1963_v34, %v4855_v54  ;;  %v2154_v61 = vadd.f32 %v4568_v13, %v1961_v18  ;;  %v1965_v62 = vpop.f32.mrb[43].mxu1  ;;  %3017 = vmatprep.subr.bf16.mxu0 %v2281_v16 }
 0x27c   :  { %3018 = vmatpush3.bf16.msra.mxu0 %v4539_v22 }
 0x27d   :  { %v2157_v49 = vadd.f32 %v4573_v11, %v1964_v9  ;;  %v2252_v31 = vmax.f32 %v2154_v61, 0.0  ;;  %v4859_v61 = vld [vmem:[#allocation29_spill] sm:$0xff] }
 0x27f   :  { %v2253_v12 = vmax.f32 %v2157_v49, 0.0 }
 0x280   :  { %v1968_v58 = vpop.f32.mrb[44].mxu1 }
 0x281   :  { %v2282_v25 = vpack.c.bf16 %v2253_v12, %v2252_v31  ;;  %v1969_v52 = vadd.f32 %v1968_v58, %v4856_v63  ;;  %v1970_v36 = vpop.f32.mrb[45].mxu1 }
 0x282   :  { %v1971_v19 = vpop.f32.mrb[46].mxu1 }
 0x283   :  { %v2162_v2 = vadd.f32 %v4563_v28, %v1969_v52  ;;  %v1972_v13 = vadd.f32 %v1971_v19, %v4857_v1  ;;  %v1973_v51 = vpop.f32.mrb[47].mxu1  ;;  %3019 = vmatprep.subr.bf16.mxu0 %v2282_v25  ;;  %v4860_v25 = vld [vmem:[#allocation34_spill] sm:$0xff] }
 0x284   :  { %3020 = vmatpush3.bf16.msra.mxu0 %v4543_v59 }
 0x285   :  { %v2165_v22 = vadd.f32 %v4570_v53, %v1972_v13  ;;  %v2254_v7 = vmax.f32 %v2162_v2, 0.0  ;;  %v4861_v2 = vld [vmem:[#allocation33_spill] sm:$0xff] }
 0x287   :  { %v2255_v11 = vmax.f32 %v2165_v22, 0.0  ;;  %v4862_v22 = vld [vmem:[#allocation40_spill] sm:$0xff] }
 0x288   :  { %v1976_v18 = vpop.f32.mrb[48].mxu1 }
 0x289   :  { %v1977_v16 = vadd.f32 %v1976_v18, %v4858_v38  ;;  %v1978_v34 = vpop.f32.mrb[49].mxu1  ;;  %v2283_v54 = vpack.c.bf16 %v2255_v11, %v2254_v7 }
 0x28a   :  { %v1979_v9 = vpop.f32.mrb[50].mxu1 }
 0x28b   :  { %v1980_v62 = vadd.f32 %v1979_v9, %v4859_v61  ;;  %v2170_v28 = vadd.f32 %v4580_v26, %v1977_v16  ;;  %v1981_v49 = vpop.f32.mrb[51].mxu1  ;;  %3021 = vmatprep.subr.bf16.mxu0 %v2283_v54  ;;  %v4863_v16 = vld [vmem:[#allocation39_spill] sm:$0xff] }
 0x28c   :  { %3022 = vmatpush3.bf16.msra.mxu0 %v4547_v43 }
 0x28d   :  { %v2173_v59 = vadd.f32 %v4585_v40, %v1980_v62  ;;  %v2256_v31 = vmax.f32 %v2170_v28, 0.0  ;;  %v4864_v28 = vld [vmem:[#allocation44_spill] sm:$0xff] }
 0x28f   :  { %v2257_v53 = vmax.f32 %v2173_v59, 0.0 }
 0x290   :  { %v1984_v12 = vpop.f32.mrb[52].mxu1 }
 0x291   :  { %v2284_v58 = vpack.c.bf16 %v2257_v53, %v2256_v31  ;;  %v1985_v63 = vadd.f32 %v1984_v12, %v4860_v25  ;;  %v1986_v52 = vpop.f32.mrb[53].mxu1  ;;  %v4865_v12 = vld [vmem:[#allocation43_spill] sm:$0xff] }
 0x292   :  { %v1987_v36 = vpop.f32.mrb[54].mxu1  ;;  %v4866_v52 = vld [vmem:[#allocation50_spill] sm:$0xff] }
 0x293   :  { %v2178_v19 = vadd.f32 %v4575_v5, %v1985_v63  ;;  %v1988_v1 = vadd.f32 %v1987_v36, %v4861_v2  ;;  %v1989_v13 = vpop.f32.mrb[55].mxu1  ;;  %3023 = vmatprep.subr.bf16.mxu0 %v2284_v58 }
 0x294   :  { %3024 = vmatpush3.bf16.msra.mxu0 %v4557_v57 }
 0x295   :  { %v2181_v43 = vadd.f32 %v4582_v33, %v1988_v1  ;;  %v2258_v26 = vmax.f32 %v2178_v19, 0.0 }
 0x297   :  { %v2259_v40 = vmax.f32 %v2181_v43, 0.0  ;;  %v4867_v43 = vld [vmem:[#allocation49_spill] sm:$0xff] }
 0x298   :  { %v1992_v51 = vpop.f32.mrb[56].mxu1 }
 0x299   :  { %v1993_v7 = vadd.f32 %v1992_v51, %v4862_v22  ;;  %v1994_v11 = vpop.f32.mrb[57].mxu1  ;;  %v2285_v18 = vpack.c.bf16 %v2259_v40, %v2258_v26  ;;  %v3505_v51 = vmov 0.0  }
 0x29a   :  { %v1995_v38 = vpop.f32.mrb[58].mxu1 }
 0x29b   :  { %v1996_v34 = vadd.f32 %v1995_v38, %v4863_v16  ;;  %v2186_v5 = vadd.f32 %v4592_v42, %v1993_v7  ;;  %v1997_v54 = vpop.f32.mrb[59].mxu1  ;;  %3025 = vmatprep.subr.bf16.mxu0 %v2285_v18  ;;  %v4868_v16 = vld [vmem:[#allocation51_spill] sm:$0xff] }
 0x29c   :  { %3026 = vmatpush3.bf16.msra.mxu0 %v4565_v17  ;;  %v3365_v54 = vld [vmem:[%s4766_s3 + $0x18] ss:$12 sps:$4 sm:$0xff]  }
 0x29d   :  { %v2189_v57 = vadd.f32 %v4597_v3, %v1996_v34  ;;  %v2260_v9 = vmax.f32 %v2186_v5, 0.0 }
 0x29f   :  { %v2261_v33 = vmax.f32 %v2189_v57, 0.0 }
 0x2a0   :  { %v2000_v61 = vpop.f32.mrb[60].mxu1 }
 0x2a1   :  { %v2286_v62 = vpack.c.bf16 %v2261_v33, %v2260_v9  ;;  %v2001_v49 = vadd.f32 %v2000_v61, %v4864_v28  ;;  %v2002_v59 = vpop.f32.mrb[61].mxu1  ;;  %v3368_v61 = vld [vmem:[%s4766_s3 + $0x30] ss:$12 sps:$4 sm:$0xff]  }
 0x2a2   :  { %v2003_v31 = vpop.f32.mrb[62].mxu1 }
 0x2a3   :  { %v2194_v53 = vadd.f32 %v4587_v47, %v2001_v49  ;;  %v2004_v58 = vadd.f32 %v2003_v31, %v4865_v12  ;;  %v2005_v25 = vpop.f32.mrb[63].mxu1  ;;  %3027 = vmatprep.subr.bf16.mxu0 %v2286_v62  ;;  %v3372_v31 = vld [vmem:[%s4766_s3 + $0x64] ss:$12 sps:$4 sm:$0xff]  }
 0x2a4   :  { %3028 = vmatpush3.bf16.msra.mxu0 %v4577_v41  ;;  %v3360_v41 = vld [vmem:[%s4766_s3] ss:$12 sps:$4 sm:$0xff]  }
 0x2a5   :  { %v2197_v17 = vadd.f32 %v4594_v30, %v2004_v58  ;;  %v2262_v42 = vmax.f32 %v2194_v53, 0.0  ;;  %v3363_v30 = vld [vmem:[%s4766_s3 + $0x1c] ss:$12 sps:$4 sm:$0xff]   ;;  %v3375_v58 = vld [vmem:[%s4766_s3 + $0x60] ss:$12 sps:$4 sm:$0xff]  }
 0x2a6   :  { %v3376_v25 = vld [vmem:[%s4766_s3 + $0x20] ss:$12 sps:$4 sm:$0xff]  }
 0x2a7   :  { %v2263_v3 = vmax.f32 %v2197_v17, 0.0  ;;  %v3377_v17 = vld [vmem:[%s4766_s3 + $0x7c] ss:$12 sps:$4 sm:$0xff]  }
 0x2a8   :  { %v2008_v63 = vpop.f32.mrb[64].mxu1 }
 0x2a9   :  { %v2009_v36 = vadd.f32 %v2008_v63, %v4866_v52  ;;  %v2010_v19 = vpop.f32.mrb[65].mxu1  ;;  %v2287_v2 = vpack.c.bf16 %v2263_v3, %v2262_v42  ;;  %v3380_v42 = vld [vmem:[%s4766_s3 + $0x78] ss:$12 sps:$4 sm:$0xff]   ;;  %v3381_v3 = vld [vmem:[%s4766_s3 + $0x50] ss:$12 sps:$4 sm:$0xff]  }
 0x2aa   :  { %v2011_v1 = vpop.f32.mrb[66].mxu1  ;;  %v3382_v63 = vld [vmem:[%s4766_s3 + $0x68] ss:$12 sps:$4 sm:$0xff]   ;;  %v3383_v52 = vld [vmem:[%s4766_s3 + $0x80] ss:$12 sps:$4 sm:$0xff]  }
 0x2ab   :  { %v2202_v13 = vadd.f32 %v4602_v37, %v2009_v36  ;;  %v2012_v47 = vadd.f32 %v2011_v1, %v4867_v43  ;;  %v2013_v26 = vpop.f32.mrb[67].mxu1  ;;  %3029 = vmatprep.subr.bf16.mxu0 %v2287_v2  ;;  %v2665_v36 = vld [vmem:[%s4767_s4] sm:$0x1] }
 0x2ac   :  { %3030 = vmatpush3.bf16.msra.mxu0 %v4589_v32 }
 0x2ad   :  { %v2205_v40 = vadd.f32 %v4608_v20, %v2012_v47  ;;  %3231 = vmatprep.subr.bf16.mxu0 %v3505_v51  ;;  %v2264_v37 = vmax.f32 %v2202_v13, 0.0 }
 0x2af   :  { %v2265_v22 = vmax.f32 %v2205_v40, 0.0  ;;  %2518 = vmatmul.mubr.bf16.vlgmr.msra.gmra.mrb[100].mxu0 %v3360_v41 }
 0x2b0   :  { %v2016_v7 = vpop.f32.mrb[68].mxu1  ;;  %3232 = vmatpush3.bf16.msra.mxu0 %v2666_v55  ;;  %2525 = vmatprep.mubr.bf16.mxu0 %v3363_v30 }
 0x2b1   :  { %v2017_v32 = vadd.f32 %v2016_v7, %v4214_v29  ;;  %v2018_v11 = vpop.f32.mrb[69].mxu1  ;;  %v2288_v18 = vpack.c.bf16 %v2265_v22, %v2264_v37  ;;  %3233 = vmatprep.subr.bf16.mxu0 %v3505_v51  ;;  %v3366_v29 = vld [vmem:[%s4766_s3 + $0x34] ss:$12 sps:$4 sm:$0xff]   ;;  %v2324_v22 = vpop.permute.xlu1 %2323 }
 0x2b2   :  { %v2019_v38 = vpop.f32.mrb[70].mxu1 }
 0x2b3   :  { %v2210_v20 = vadd.f32 %v4599_v14, %v2017_v32  ;;  %v2020_v34 = vadd.f32 %v2019_v38, %v4868_v16  ;;  %3195 = vmatprep.subr.bf16.mxu1 %v2288_v18  ;;  %v2021_v5 = vpop.f32.mrb[71].mxu1  ;;  %v2319_v32 = vpop.permute.xlu0 %2318 }
 0x2b4   :  { %3196 = vmatpush3.bf16.msra.mxu1 %v2288_v18  ;;  %3234 = vmatpush3.bf16.msra.mxu0 %v2667_v4 }
 0x2b5   :  { %v2213_v39 = vadd.f32 %v4604_v56, %v2020_v34  ;;  %3235 = vmatprep.subr.bf16.mxu0 %v3505_v51  ;;  %v2266_v6 = vmax.f32 %v2210_v20, 0.0  ;;  %v2334_v38 = vpop.permute.xlu1 %2333 }
 0x2b7   :  { %v2267_v55 = vmax.f32 %v2213_v39, 0.0  ;;  %2526 = vmatmul.mubr.bf16.gmra.mrb[104].mxu0 %v3365_v54  ;;  %v2329_v34 = vpop.permute.xlu0 %2328 }
 0x2b8   :  { %v2024_v14 = vpop.f32.mrb[72].mxu1  ;;  %3236 = vmatpush3.bf16.msra.mxu0 %v2668_v15  ;;  %2533 = vmatprep.mubr.bf16.mxu0 %v3366_v29 }
 0x2b9   :  { %v2025_v60 = vadd.f32 %v2024_v14, %v4218_v35  ;;  %v2026_v27 = vpop.f32.mrb[73].mxu1  ;;  %v2289_v4 = vpack.c.bf16 %v2267_v55, %v2266_v6  ;;  %3237 = vmatprep.subr.bf16.mxu0 %v3505_v51  ;;  %v3369_v35 = vld [vmem:[%s4766_s3 + $0x4c] ss:$12 sps:$4 sm:$0xff]   ;;  %v2344_v29 = vpop.permute.xlu1 %2343 }
 0x2ba   :  { %v2027_v57 = vpop.f32.mrb[74].mxu1 }
 0x2bb   :  { %v2028_v56 = vadd.f32 %v2027_v57, %v4216_v45  ;;  %v2218_v9 = vadd.f32 %v4615_v0, %v2025_v60  ;;  %3197 = vmatprep.subr.bf16.mxu1 %v2289_v4  ;;  %v2029_v33 = vpop.f32.mrb[75].mxu1  ;;  %v2339_v6 = vpop.permute.xlu0 %2338 }
 0x2bc   :  { %3198 = vmatpush3.bf16.msra.mxu1 %v2289_v4  ;;  %3238 = vmatpush3.bf16.msra.mxu0 %v2669_v44  ;;  %v3371_v44 = vld [vmem:[%s4766_s3 + $0x48] ss:$12 sps:$4 sm:$0xff]  }
 0x2bd   :  { %v2221_v50 = vadd.f32 %v4621_v21, %v2028_v56  ;;  %v2268_v45 = vmax.f32 %v2218_v9, 0.0  ;;  %v2354_v57 = vpop.permute.xlu1 %2353 }
 0x2bf   :  { %v2269_v8 = vmax.f32 %v2221_v50, 0.0  ;;  %2534 = vmatmul.mubr.bf16.gmra.mrb[108].mxu0 %v3368_v61  ;;  %v2349_v56 = vpop.permute.xlu0 %2348 }
 0x2c0   :  { %v2032_v15 = vpop.f32.mrb[76].mxu1  ;;  %2541 = vmatprep.mubr.bf16.mxu0 %v3369_v35 }
 0x2c1   :  { %v2290_v0 = vpack.c.bf16 %v2269_v8, %v2268_v45  ;;  %v2033_v62 = vadd.f32 %v2032_v15, %v4227_v46  ;;  %v2034_v28 = vpop.f32.mrb[77].mxu1 }
 0x2c2   :  { %v2035_v49 = vpop.f32.mrb[78].mxu1 }
 0x2c3   :  { %v2226_v59 = vadd.f32 %v4612_v23, %v2033_v62  ;;  %v2036_v24 = vadd.f32 %v2035_v49, %v4869_v48  ;;  %3199 = vmatprep.subr.bf16.mxu1 %v2290_v0  ;;  %v2037_v21 = vpop.f32.mrb[79].mxu1 }
 0x2c4   :  { %3200 = vmatpush3.bf16.msra.mxu1 %v2290_v0 }
 0x2c5   :  { %v2229_v53 = vadd.f32 %v4617_v10, %v2036_v24  ;;  %v2270_v46 = vmax.f32 %v2226_v59, 0.0  ;;  %v3379_v10 = vld [vmem:[%s4766_s3 + $0x38] ss:$12 sps:$4 sm:$0xff]  }
 0x2c7   :  { %v2271_v12 = vmax.f32 %v2229_v53, 0.0  ;;  %2542 = vmatmul.mubr.bf16.gmra.mrb[112].mxu0 %v3371_v44 }
 0x2c8   :  { %2549 = vmatprep.mubr.bf16.mxu0 %v3372_v31 }
 0x2c9   :  { %v2291_v23 = vpack.c.bf16 %v2271_v12, %v2270_v46 }
 0x2cb   :  { %3201 = vmatprep.subr.bf16.mxu1 %v2291_v23 }
 0x2cc   :  { %3202 = vmatpush3.bf16.msra.mxu1 %v2291_v23 }
 0x2cd   :  { %3215 = vmatprep.subr.bf16.mxu1 %v3505_v51 }
 0x2cf   :  { %2550 = vmatmul.mubr.bf16.gmra.mrb[116].mxu0 %v3375_v58  ;;  %3204 = vmatmul.mubr.msk.bf16.vlgmr.msra.gmra.mrb[80].mxu1 %vm2466_vm2, %v3376_v25  ;;  %v2364_v58 = vpop.permute.xlu1 %2363  ;;  %v2359_v25 = vpop.permute.xlu0 %2358 }
 0x2d0   :  { %2557 = vmatprep.mubr.bf16.mxu0 %v3377_v17  ;;  %3207 = vmatprep.mubr.msk.bf16.mxu1 %vm2466_vm2, %v3379_v10 }
 0x2d7   :  { %2558 = vmatmul.mubr.bf16.gmra.mrb[120].mxu0 %v3380_v42  ;;  %3208 = vmatmul.mubr.msk.bf16.gmra.mrb[84].mxu1 %vm2466_vm2, %v3381_v3 }
 0x2d8   :  { %3211 = vmatprep.mubr.msk.bf16.mxu1 %vm2466_vm2, %v3382_v63  ;;  %3239 = vmatprep.mubr.msk.bf16.mxu0 %vm3506_vm3, %v3505_v51 }
 0x2df   :  { %3212 = vmatmul.mubr.msk.bf16.gmra.mrb[88].mxu1 %vm2466_vm2, %v3383_v52  ;;  %3240 = vmatmul.mubr.msk.bf16.vlgmr.msra.gmra.mrb[124].mxu0 %vm2466_vm2, %v2665_v36 }
 0x2e0   :  { %3227 = vmatprep.mubr.msk.bf16.mxu1 %vm3506_vm3, %v3505_v51 }
 0x382   :  { %v3031_v19 = vpop.f32.mrb[100].mxu0 }
 0x383   :  { %v3032_v2 = vpop.f32.mrb[101].mxu0 }
 0x384   :  { %v3033_v1 = vadd.f32 %v3032_v2, %v3031_v19  ;;  %v3034_v13 = vpop.f32.mrb[102].mxu0 }
 0x385   :  { %v3035_v43 = vpop.f32.mrb[103].mxu0 }
 0x386   :  { %v3036_v47 = vadd.f32 %v3035_v43, %v3034_v13  ;;  %v2520_v35 = vadd.f32 %v3033_v1, %v2319_v32 }
 0x388   :  { %v2523_v59 = vadd.f32 %v3036_v47, %v2324_v22 }
 0x38a   :  { %v3037_v26 = vpop.f32.mrb[104].mxu0 }
 0x38b   :  { %v3038_v41 = vpop.f32.mrb[105].mxu0 }
 0x38c   :  { %v3039_v30 = vadd.f32 %v3038_v41, %v3037_v26  ;;  %v3040_v40 = vpop.f32.mrb[106].mxu0 }
 0x38d   :  { %v3041_v37 = vpop.f32.mrb[107].mxu0 }
 0x38e   :  { %v3042_v7 = vadd.f32 %v3041_v37, %v3040_v40  ;;  %v2528_v9 = vadd.f32 %v3039_v30, %v2329_v34 }
 0x390   :  { %v2531_v15 = vadd.f32 %v3042_v7, %v2334_v38 }
 0x392   :  { %v3043_v11 = vpop.f32.mrb[108].mxu0 }
 0x393   :  { %v3044_v18 = vpop.f32.mrb[109].mxu0 }
 0x394   :  { %v3045_v20 = vadd.f32 %v3044_v18, %v3043_v11  ;;  %v3046_v16 = vpop.f32.mrb[110].mxu0  ;;  %v2369_v18 = vpop.permute.xlu0 %2368 }
 0x395   :  { %v3047_v5 = vpop.f32.mrb[111].mxu0 }
 0x396   :  { %v3048_v54 = vadd.f32 %v3047_v5, %v3046_v16  ;;  %v2536_v52 = vadd.f32 %v3045_v20, %v2339_v6  ;;  %v2374_v5 = vpop.permute.xlu1 %2373 }
 0x398   :  { %v2539_v41 = vadd.f32 %v3048_v54, %v2344_v29 }
 0x39a   :  { %v3049_v39 = vpop.f32.mrb[112].mxu0 }
 0x39b   :  { %v3050_v55 = vpop.f32.mrb[113].mxu0 }
 0x39c   :  { %v3051_v14 = vadd.f32 %v3050_v55, %v3049_v39  ;;  %v3052_v60 = vpop.f32.mrb[114].mxu0 }
 0x39d   :  { %v3053_v27 = vpop.f32.mrb[115].mxu0 }
 0x39e   :  { %v3054_v4 = vadd.f32 %v3053_v27, %v3052_v60  ;;  %v2544_v10 = vadd.f32 %v3051_v14, %v2349_v56 }
 0x3a0   :  { %v2547_v1 = vadd.f32 %v3054_v4, %v2354_v57 }
 0x3a2   :  { %v3055_v33 = vpop.f32.mrb[116].mxu0  ;;  %v3205_v61 = vpop.f32.mrb[80].mxu1 }
 0x3a3   :  { %v2609_v50 = vadd.f32 %v3205_v61, %v2528_v9  ;;  %v3056_v45 = vpop.f32.mrb[117].mxu0  ;;  %v2600_v8 = vpop.f32.mrb[81].mxu1 }
 0x3a4   :  { %v3057_v0 = vadd.f32 %v3056_v45, %v3055_v33  ;;  %v2601_v62 = vadd.f32 %v2600_v8, %v2520_v35  ;;  %v3058_v28 = vpop.f32.mrb[118].mxu0  ;;  %v3206_v49 = vpop.f32.mrb[82].mxu1 }
 0x3a5   :  { %v2612_v48 = vadd.f32 %v3206_v49, %v2531_v15  ;;  %v3059_v24 = vpop.f32.mrb[119].mxu0  ;;  %v2603_v44 = vpop.f32.mrb[83].mxu1  ;;  %v2649_v53 = vmax.f32 %v2609_v50, 0.0  ;;  %v2670_v15 = vld [vmem:[%s4768_s5] sm:$0x1]  ;;  %s3484_s5 = scalar_lea.vmem %s2772_s1, 32 }
 0x3a6   :  { %v3060_v21 = vadd.f32 %v3059_v24, %v3058_v28  ;;  %v2604_v31 = vadd.f32 %v2603_v44, %v2523_v59  ;;  %v2647_v12 = vmax.f32 %v2601_v62, 0.0  ;;  %v2552_v29 = vadd.f32 %v3057_v0, %v2359_v25  ;;  %v2761_v44 = vpop.permute.xlu0 %2760  ;;  %p3486_p2 = scmp.lt.s32.totalorder %s3484_s5, %s3480_s21 }
 0x3a7   :  { %v2650_v46 = vmax.f32 %v2612_v48, 0.0 }
 0x3a8   :  { %v2648_v23 = vmax.f32 %v2604_v31, 0.0  ;;  %v2555_v4 = vadd.f32 %v3060_v21, %v2364_v58  ;;  %p3487_p3 = por %p3486_p2, %p3485_p1 }
 0x3a9   :  { %v2660_v17 = vpack.c.bf16 %v2650_v46, %v2649_v53 }
 0x3aa   :  { %v2659_v42 = vpack.c.bf16 %v2648_v23, %v2647_v12  ;;  %v3061_v3 = vpop.f32.mrb[120].mxu0  ;;  %v3209_v63 = vpop.f32.mrb[84].mxu1  ;;  %p3488_p4 = pnand %p3487_p3, %p3481_p0 }
 0x3ab   :  { %v2625_v36 = vadd.f32 %v3209_v63, %v2544_v10  ;;  %v3062_v19 = vpop.f32.mrb[121].mxu0  ;;  %v2616_v2 = vpop.f32.mrb[85].mxu1 }
 0x3ac   :  { %v3063_v13 = vadd.f32 %v3062_v19, %v3061_v3  ;;  %v2617_v43 = vadd.f32 %v2616_v2, %v2536_v52  ;;  %v3064_v47 = vpop.f32.mrb[122].mxu0  ;;  %v3210_v26 = vpop.f32.mrb[86].mxu1  ;;  %3216 = vmatpush3.bf16.msra.mxu1 %v2659_v42 }
 0x3ad   :  { %v2628_v30 = vadd.f32 %v3210_v26, %v2547_v1  ;;  %v3065_v40 = vpop.f32.mrb[123].mxu0  ;;  %v2619_v37 = vpop.f32.mrb[87].mxu1  ;;  %3217 = vmatprep.subr.bf16.mxu1 %v3505_v51  ;;  %v2653_v32 = vmax.f32 %v2625_v36, 0.0 }
 0x3ae   :  { %v3066_v22 = vadd.f32 %v3065_v40, %v3064_v47  ;;  %v2620_v7 = vadd.f32 %v2619_v37, %v2539_v41  ;;  %v2651_v38 = vmax.f32 %v2617_v43, 0.0  ;;  %v2560_v34 = vadd.f32 %v3063_v13, %v2369_v18 }
 0x3af   :  { %v2654_v11 = vmax.f32 %v2628_v30, 0.0 }
 0x3b0   :  { %v2652_v20 = vmax.f32 %v2620_v7, 0.0  ;;  %3218 = vmatpush3.bf16.msra.mxu1 %v2660_v17  ;;  %v2563_v14 = vadd.f32 %v3066_v22, %v2374_v5 }
 0x3b1   :  { %v2662_v16 = vpack.c.bf16 %v2654_v11, %v2653_v32  ;;  %3219 = vmatprep.subr.bf16.mxu1 %v3505_v51 }
 0x3b2   :  { %v2661_v39 = vpack.c.bf16 %v2652_v20, %v2651_v38  ;;  %v3213_v54 = vpop.f32.mrb[88].mxu1  ;;  %v2752_v0 = vpop.f32.mrb[124].mxu0 }
 0x3b3   :  { %v2641_v6 = vadd.f32 %v3213_v54, %v2560_v34  ;;  %v2632_v55 = vpop.f32.mrb[89].mxu1  ;;  %v3241_v62 = vpop.f32.mrb[125].mxu0 }
 0x3b4   :  { %v2633_v60 = vadd.f32 %v2632_v55, %v2552_v29  ;;  %v3214_v27 = vpop.f32.mrb[90].mxu1  ;;  %3220 = vmatpush3.bf16.msra.mxu1 %v2661_v39  ;;  %v2755_v28 = vpop.f32.mrb[126].mxu0 }
 0x3b5   :  { %v2644_v57 = vadd.f32 %v3214_v27, %v2563_v14  ;;  %v2635_v56 = vpop.f32.mrb[91].mxu1  ;;  %3221 = vmatprep.subr.bf16.mxu1 %v3505_v51  ;;  %v2657_v33 = vmax.f32 %v2641_v6, 0.0  ;;  %v3242_v49 = vpop.f32.mrb[127].mxu0 }
 0x3b6   :  { %v2636_v9 = vadd.f32 %v2635_v56, %v2555_v4  ;;  %v2655_v35 = vmax.f32 %v2633_v60, 0.0 }
 0x3b7   :  { %v2658_v61 = vmax.f32 %v2644_v57, 0.0 }
 0x3b8   :  { %v2656_v50 = vmax.f32 %v2636_v9, 0.0  ;;  %3222 = vmatpush3.bf16.msra.mxu1 %v2662_v16 }
 0x3b9   :  { %v2664_v45 = vpack.c.bf16 %v2658_v61, %v2657_v33  ;;  %3223 = vmatprep.subr.bf16.mxu1 %v3505_v51 }
 0x3ba   :  { %v2663_v8 = vpack.c.bf16 %v2656_v50, %v2655_v35 }
 0x3bc   :  { %3224 = vmatpush3.bf16.msra.mxu1 %v2663_v8 }
 0x3bd   :  { %3225 = vmatprep.subr.bf16.mxu1 %v3505_v51 }
 0x3c0   :  { %3226 = vmatpush3.bf16.msra.mxu1 %v2664_v45 }
 0x3c3   :  { %3228 = vmatmul.mubr.msk.bf16.vlgmr.msra.gmra.mrb[92].mxu1 %vm2671_vm4, %v2670_v15 }
 0x496   :  { %v2709_v59 = vpop.f32.mrb[92].mxu1 }
 0x497   :  { %v2753_v48 = vadd.f32 %v2752_v0, %v2709_v59  ;;  %v3229_v24 = vpop.f32.mrb[93].mxu1 }
 0x498   :  { %v2712_v21 = vpop.f32.mrb[94].mxu1 }
 0x499   :  { %v3230_v31 = vpop.f32.mrb[95].mxu1  ;;  %v2763_v51 = vadd.f32 %v2761_v44, %v2753_v48 }
 0x49b   :  { %2764 = vst [vmem:[#allocation2] sm:$0x1] %v2763_v51 }
 0x49c   :  { %3491 = shalt.err (!%p3488_p4)
}
 0x49d   :  { %s3492_s23 = scalar_lea.hbm %s4770_s7, 16 }
 0x49e   :  { %p3493_p5 = scmp.ne.s32.totalorder %s4770_s7, %s3492_s23  ;;  %p3496_p6 = scmp.lt.u32.totalorder %s3492_s23, %s4770_s7 }
 0x4a0   :  { %p3498_p7 = pnand %p3496_p6, %p3493_p5 }
 0x4a2   :  { %3501 = shalt.err (!%p3498_p7)
}
 0x4a3   :  { %2774 = dma.vmem_to_hbm [thread:$0]  %s2772_s1, 16, %s4770_s7, [#allocation3]  }
 0x4a4   :  { %3502 = dma.done.wait [#allocation3], 16  }
 0x4a5   :  { %3503 = vsyncadd [#allocation3], 4294967280 }
 0x4a6   :  { %2778 = vsyncpa [#allocation3], 1 }

</bundles_post_ra>
